<compile_context>
chip_gen: v6e
topology: v6e:2x2x1
jax: 0.10.0
libtpu: 0.0.40
codegen_flags: <defaults>
</compile_context>

<pallas_src>
import functools

import jax
import jax.numpy as jnp
import numpy as np
from jax.experimental import pallas as pl
from jax.experimental.pallas import tpu as pltpu


def _round_up(v, m):
    return (v + m - 1) // m * m


def _geometry(x_shape, skip_shape, cout):
    n, cin, h, w = x_shape
    ns, cs, hs, ws = skip_shape
    assert n == ns and cin == cout + cs, (x_shape, skip_shape, cout)
    hu, wu = 2 * h, 2 * w                   # ConvTranspose2d(k=2, s=2) output
    wpad = wu + 4                           # after ReflectionPad2d((2, 2, 0, 0))
    stride = ws                             # shared flattened row stride (= skip width)
    assert wpad <= ws and hu <= hs, "skip tensor too small for the fused layout"
    h1 = hu - 2                             # conv1 (valid 3x3) output rows
    h2 = h1 - 2                             # conv2 output rows
    wo = wpad                               # final width (conv -2, reflect pad +2, twice)
    m2 = h2 * stride                        # conv2 columns computed (full-stride rows)
    m1 = _round_up(max(h1 * stride, 2 * stride + 2 + m2), 8)
    upw_cols = _round_up(2 * stride + 2 + m1, 8)
    top = int(round((hs - hu) / 2.0))       # torchvision CenterCrop offsets
    left = int(round((ws - wpad) / 2.0))
    skip_off = top * ws + left
    assert skip_off + 2 * stride + 2 + m1 <= hs * ws
    # the zero-filled last column of the shifted view must never be selected by the
    # "col % stride == 0" reflection mask (holds for these shapes; guard anyway).
    assert (m1 - 1) % stride != 0
    return dict(n=n, cin=cin, cs=cs, h=h, w=w, hs=hs, ws=ws, cout=cout, hu=hu, wu=wu,
                wpad=wpad, stride=stride, h1=h1, h2=h2, wo=wo, m1=m1, m2=m2,
                upw_cols=upw_cols, skip_off=skip_off)


# ---------------------------------------------------------------------------
# The fused Pallas kernel (one grid step = one batch element)
# ---------------------------------------------------------------------------
def _expanding_path_kernel(x_ref, skip_ref, g_ref, upw_ref, w1_ref, w2_ref, ep_ref, mask_ref,
                           o_ref, *, cout, stride, m1, m2, skip_off):
    f32, bf16 = jnp.float32, jnp.bfloat16
    x = x_ref[...]            # (Cin,   H*W)   bf16, channel-major, flat spatial
    skip = skip_ref[...]      # (Cskip, Hs*Ws) bf16, channel-major, row stride = Ws

    def refl_pad1(y, width):
        # ReflectionPad2d((1, 1, 0, 0)) on a row-flattened (C, width) image with row stride
        # `stride`:  col k ->  k==0: y[q+1];  k==wpad-1: y[q-3];  else: y[q-1].
        # Masks are precomputed 0/1 rows; the arithmetic blend is exact up to f32 rounding.
        m0 = mask_ref[0:1, :width]                       # 1.0 where q % stride == 0
        mw = mask_ref[1:2, :width]                       # 1.0 where q % stride == wpad-1
        yp = jnp.concatenate(
            [jnp.zeros((y.shape[0], 3), y.dtype), y, jnp.zeros((y.shape[0], 1), y.dtype)],
            axis=1)
        sp3 = yp[:, 0:width]                             # [q] = y[q-3]
        sp1 = yp[:, 2:2 + width]                         # [q] = y[q-1]
        sm1 = yp[:, 4:4 + width]                         # [q] = y[q+1]
        return sp1 + m0 * (sm1 - sp1) + mw * (sp3 - sp1)

    # ---- upconv: ConvTranspose2d(k=2, s=2) + ReLU + ReflectionPad((2,2,0,0)) --------------
    # two matmuls: stacked sub-pixel weights, then one 0/1 scatter (pixel shuffle + width
    # pad) kept in f32.  BN1's affine is folded into the conv1 weights / bias.
    p = jnp.dot(upw_ref[...], x, preferred_element_type=f32)            # (4*Cout, H*W)
    p = jnp.concatenate([p[ab * cout:(ab + 1) * cout, :] for ab in range(4)], axis=1)
    z = jnp.dot(p, g_ref[...], preferred_element_type=f32)              # (Cout, UPW) f32
    up = jnp.maximum(z + ep_ref[0], 0.0).astype(bf16)

    # ---- conv1: Conv2d(in_ch, out_ch, 3) on concat([up, crop(skip)]) + ReLU + pad ---------
    # channel concat -> interleaved K-stack of the weight columns;
    # CenterCrop      -> constant column offset `skip_off` into the flattened skip tensor.
    blks = []
    for di in range(3):
        for dj in range(3):
            s = di * stride + dj
            blks.append(up[:, s:s + m1])
            blks.append(skip[:, skip_off + s:skip_off + s + m1])
    rhs1 = jnp.concatenate(blks, axis=0)                                 # (9*Cin, M1) bf16
    y1 = jnp.dot(w1_ref[...], rhs1, preferred_element_type=f32) + ep_ref[1]
    c1 = refl_pad1(jnp.maximum(y1, 0.0), m1).astype(bf16)                # BN2 folded into w2

    # ---- conv2: Conv2d(out_ch, out_ch, 3) + ReLU + pad + BN3 ------------------------------
    rhs2 = jnp.concatenate(
        [c1[:, di * stride + dj:di * stride + dj + m2] for di in range(3) for dj in range(3)],
        axis=0)                                                          # (9*Cout, M2) bf16
    y2 = jnp.dot(w2_ref[...], rhs2, preferred_element_type=f32) + ep_ref[2]
    c2 = refl_pad1(jnp.maximum(y2, 0.0), m2) * ep_ref[3] + ep_ref[4]

    # lane-dense store of the full stride-padded rows; the wrapper crops each row to `wo`.
    o_ref[...] = c2.astype(o_ref.dtype)


# ---------------------------------------------------------------------------
# Parameter / constant preparation (hoisted out of the forward pass)
# ---------------------------------------------------------------------------
def prepare_constants(params, x_shape, skip_shape):
    cout = params["upw"].shape[1]
    geo = _geometry(x_shape, skip_shape, cout)
    cin, cs = geo["cin"], geo["cs"]
    h, w, wu = geo["h"], geo["w"], geo["wu"]
    hw = h * w
    stride, upw_cols, wpad = geo["stride"], geo["upw_cols"], geo["wpad"]

    # 0/1 matrix scattering the 4 (a, b) ConvTranspose sub-pixel outputs into the
    # ReflectionPad2d((2,2,0,0))-padded, row-flattened (row stride = skip width) image.
    refl = [2, 1] + list(range(wu)) + [wu - 2, wu - 3]   # padded col -> unpadded col
    G = np.zeros((2, 2, hw, upw_cols), np.float32)
    for a in range(2):
        for b in range(2):
            for i in range(h):
                for j in range(w):
                    r, u = 2 * i + a, 2 * j + b
                    for k, uu in enumerate(refl):
                        if uu == u:
                            G[a, b, i * w + j, r * stride + k] = 1.0
    g_stack = jnp.asarray(G.reshape(4 * hw, upw_cols), jnp.float32)      # rows: ab*hw + pix

    def bn_affine(bn, eps=1e-5):
        gamma, beta, rmean, rvar = bn
        scale = gamma / jnp.sqrt(rvar + eps)
        return scale, beta - rmean * scale

    s1, t1 = bn_affine(params["bn1"])
    s2, t2 = bn_affine(params["bn2"])
    s3, t3 = bn_affine(params["bn3"])

    # ConvTranspose2d weight (Cin, Cout, 2, 2) -> (4*Cout, Cin), row index = ab*Cout + c.
    upw_stack = jnp.transpose(params["upw"], (2, 3, 1, 0)).reshape(4 * cout, cin)

    # conv1 weight (Cout, Cin, 3, 3): fold BN1's scale into its up-channel half and BN1's
    # shift into the bias; columns ordered tap*Cin + ci (tap = di*3 + dj, up channels first).
    w1 = params["w1"]
    in_scale = jnp.concatenate([s1, jnp.ones((cs,), jnp.float32)])
    w1_stack = jnp.transpose(w1 * in_scale[None, :, None, None],
                             (0, 2, 3, 1)).reshape(cout, 9 * cin)
    b1f = params["b1"] + jnp.einsum("oikl,i->o", w1[:, :cout], t1)

    # conv2 weight (Cout, Cout, 3, 3): fold BN2's affine the same way.
    w2 = params["w2"]
    w2_stack = jnp.transpose(w2 * s2[None, :, None, None], (0, 2, 3, 1)).reshape(cout, 9 * cout)
    b2f = params["b2"] + jnp.einsum("oikl,i->o", w2, t2)

    # biases + BN3 epilogue params packed into ONE (5, Cout, 1) f32 input.
    ep = jnp.stack([params["upb"], b1f, b2f, s3, t3]).astype(jnp.float32)[:, :, None]

    # ReflectionPad2d((1,1,0,0)) 0/1 column masks (precomputed, shared by both pad stages).
    cm = np.arange(upw_cols) % stride
    masks = jnp.asarray(np.stack([(cm == 0), (cm == wpad - 1)]).astype(np.float32))

    return dict(G=g_stack,
                upw=upw_stack.astype(jnp.bfloat16),
                w1=w1_stack.astype(jnp.bfloat16),
                w2=w2_stack.astype(jnp.bfloat16),
                ep=ep, masks=masks)


@jax.jit
def expanding_path_forward(consts, x_nchw, skip_nchw):
    cout = consts["ep"].shape[1]
    geo = _geometry(x_nchw.shape, skip_nchw.shape, cout)
    n, cin, cs = geo["n"], geo["cin"], geo["cs"]
    hw = geo["h"] * geo["w"]
    hsws = geo["hs"] * geo["ws"]
    m2, upw_cols = geo["m2"], geo["upw_cols"]

    # NCHW reshape is free; bf16 halves the input DMA bytes (no in-kernel casts needed).
    x_flat = x_nchw.reshape(n, cin, hw).astype(jnp.bfloat16)
    skip_flat = skip_nchw.reshape(n, cs, hsws).astype(jnp.bfloat16)

    kern = functools.partial(_expanding_path_kernel, cout=cout, stride=geo["stride"],
                             m1=geo["m1"], m2=m2, skip_off=geo["skip_off"])

    out_flat = pl.pallas_call(
        kern,
        out_shape=jax.ShapeDtypeStruct((n, cout, m2), jnp.float32),
        grid=(n,),
        in_specs=[
            pl.BlockSpec((None, cin, hw), lambda b: (b, 0, 0)),
            pl.BlockSpec((None, cs, hsws), lambda b: (b, 0, 0)),
            # loop-invariant constants (scatter / weights / epilogue / masks), single block:
            pl.BlockSpec((4 * hw, upw_cols), lambda b: (0, 0)),
            pl.BlockSpec((4 * cout, cin), lambda b: (0, 0)),
            pl.BlockSpec((cout, 9 * cin), lambda b: (0, 0)),
            pl.BlockSpec((cout, 9 * cout), lambda b: (0, 0)),
            pl.BlockSpec((5, cout, 1), lambda b: (0, 0, 0)),
            pl.BlockSpec((2, upw_cols), lambda b: (0, 0)),
        ],
        out_specs=pl.BlockSpec((None, cout, m2), lambda b: (b, 0, 0)),
        compiler_params=pltpu.CompilerParams(dimension_semantics=("parallel",)),
    )(x_flat, skip_flat, consts["G"], consts["upw"], consts["w1"], consts["w2"],
      consts["ep"], consts["masks"])

    # lane-dense kernel store; drop the per-row stride-slack columns here (cheap XLA slice).
    return out_flat.reshape(n, cout, geo["h2"], geo["stride"])[..., :geo["wo"]]


# ---------------------------------------------------------------------------
# Pure-JAX (XLA) reference mirroring the PyTorch module op-for-op (eval-mode BN)
# ---------------------------------------------------------------------------
def _bn_eval_nchw(v, bn, eps=1e-5):
    gamma, beta, rmean, rvar = bn
    inv = gamma / jnp.sqrt(rvar + eps)
    return (v - rmean[None, :, None, None]) * inv[None, :, None, None] \
        + beta[None, :, None, None]


def reference_forward(params, x, skip):
    n, cin, h, w = x.shape
    upw, upb = params["upw"], params["upb"]
    cout = upw.shape[1]
    up = jnp.einsum("nchw,cdab->ndhawb", x, upw).reshape(n, cout, 2 * h, 2 * w)
    up = jax.nn.relu(up + upb[None, :, None, None])
    up = jnp.pad(up, ((0, 0), (0, 0), (0, 0), (2, 2)), mode="reflect")
    up = _bn_eval_nchw(up, params["bn1"])

    th, tw = up.shape[2], up.shape[3]
    hs, ws = skip.shape[2], skip.shape[3]
    top = int(round((hs - th) / 2.0))
    left = int(round((ws - tw) / 2.0))
    cat = jnp.concatenate([up, skip[:, :, top:top + th, left:left + tw]], axis=1)

    def conv3_relu_pad_bn(v, wgt, b, bn):
        ho, wo = v.shape[2] - 2, v.shape[3] - 2
        out = b[None, :, None, None]
        for di in range(3):
            for dj in range(3):
                out = out + jnp.einsum("nchw,oc->nohw",
                                       v[:, :, di:di + ho, dj:dj + wo], wgt[:, :, di, dj])
        out = jax.nn.relu(out)
        out = jnp.pad(out, ((0, 0), (0, 0), (0, 0), (1, 1)), mode="reflect")
        return _bn_eval_nchw(out, bn)

    y = conv3_relu_pad_bn(cat, params["w1"], params["b1"], params["bn2"])
    y = conv3_relu_pad_bn(y, params["w2"], params["b2"], params["bn3"])
    return y


# ---------------------------------------------------------------------------
# Deterministic synthetic parameters (shapes per the module __init__)
# ---------------------------------------------------------------------------
def init_params(key, in_ch, out_ch):
    ks = jax.random.split(key, 9)

    def nrm(k, shape, s=0.1):
        return s * jax.random.normal(k, shape, jnp.float32)

    def bn(k):
        k1, k2, k3, k4 = jax.random.split(k, 4)
        gamma = 1.0 + 0.1 * jax.random.normal(k1, (out_ch,), jnp.float32)
        beta = 0.1 * jax.random.normal(k2, (out_ch,), jnp.float32)
        rmean = 0.1 * jax.random.normal(k3, (out_ch,), jnp.float32)
        rvar = 1.0 + 0.5 * jax.random.uniform(k4, (out_ch,), jnp.float32)
        return (gamma, beta, rmean, rvar)

    return dict(
        upw=nrm(ks[0], (in_ch, out_ch, 2, 2)),    # ConvTranspose2d weight (Cin, Cout, 2, 2)
        upb=nrm(ks[1], (out_ch,)),
        bn1=bn(ks[2]),
        w1=nrm(ks[3], (out_ch, in_ch, 3, 3)),     # Conv2d(in_ch, out_ch, 3)
        b1=nrm(ks[4], (out_ch,)),
        bn2=bn(ks[5]),
        w2=nrm(ks[6], (out_ch, out_ch, 3, 3)),    # Conv2d(out_ch, out_ch, 3)
        b2=nrm(ks[7], (out_ch,)),
        bn3=bn(ks[8]),
    )


if __name__ == "__main__":
    key = jax.random.PRNGKey(0)
    kx, ksk, kp = jax.random.split(key, 3)

    in_ch, out_ch = 8, 4
    x = jax.random.normal(kx, (2, in_ch, 8, 8), jnp.float32)                 # NCHW
    skip = jax.random.normal(ksk, (2, in_ch - out_ch, 20, 24), jnp.float32)  # NCHW
    params = init_params(kp, in_ch, out_ch)

    consts = prepare_constants(params, x.shape, skip.shape)
    out = jax.block_until_ready(expanding_path_forward(consts, x, skip))
    assert out.shape == (2, out_ch, 12, 20), out.shape

    # self-check vs. pure-XLA reference (bf16 MXU operands -> loose tolerance)
    ref = jax.block_until_ready(reference_forward(params, x, skip))
    assert np.allclose(np.asarray(out), np.asarray(ref), rtol=5e-2, atol=5e-2), (
        float(np.max(np.abs(np.asarray(out) - np.asarray(ref)))))
    print("KERNEL_OK")
</pallas_src>

<mosaic_0001>
module attributes {stable_mosaic.version = 11 : i64} {
  func.func @_expanding_path_kernel(%arg0: i32, %arg1: memref<1x8x64xbf16, #tpu.memory_space<vmem>>, %arg2: memref<1x4x480xbf16, #tpu.memory_space<vmem>>, %arg3: memref<256x400xf32, #tpu.memory_space<vmem>>, %arg4: memref<16x8xbf16, #tpu.memory_space<vmem>>, %arg5: memref<4x72xbf16, #tpu.memory_space<vmem>>, %arg6: memref<4x36xbf16, #tpu.memory_space<vmem>>, %arg7: memref<5x4x1xf32, #tpu.memory_space<vmem>>, %arg8: memref<2x400xf32, #tpu.memory_space<vmem>>, %arg9: memref<1x4x288xf32, #tpu.memory_space<vmem>>) attributes {dimension_semantics = [#tpu.dimension_semantics<parallel>], iteration_bounds = array<i64: 2>, scalar_prefetch = 0 : i64, scratch_operands = 0 : i64, tpu.core_type = #tpu.core_type<tc>, window_params = [{transform_indices = @transform_0, window_bounds = array<i64: 1, 8, 64>}, {transform_indices = @transform_1, window_bounds = array<i64: 1, 4, 480>}, {pipeline_mode = #tpu.pipeline_mode<synchronous>, transform_indices = @transform_2, window_bounds = array<i64: 256, 400>}, {pipeline_mode = #tpu.pipeline_mode<synchronous>, transform_indices = @transform_3, window_bounds = array<i64: 16, 8>}, {pipeline_mode = #tpu.pipeline_mode<synchronous>, transform_indices = @transform_4, window_bounds = array<i64: 4, 72>}, {pipeline_mode = #tpu.pipeline_mode<synchronous>, transform_indices = @transform_5, window_bounds = array<i64: 4, 36>}, {pipeline_mode = #tpu.pipeline_mode<synchronous>, transform_indices = @transform_6, window_bounds = array<i64: 5, 4, 1>}, {pipeline_mode = #tpu.pipeline_mode<synchronous>, transform_indices = @transform_7, window_bounds = array<i64: 2, 400>}, {transform_indices = @transform_8, window_bounds = array<i64: 1, 4, 288>}]} {
    %c0 = arith.constant 0 : index
    %c0_0 = arith.constant 0 : index
    %c0_1 = arith.constant 0 : index
    %0 = vector.load %arg1[%c0, %c0_0, %c0_1] : memref<1x8x64xbf16, #tpu.memory_space<vmem>>, vector<1x8x64xbf16>
    %1 = vector.shape_cast %0 : vector<1x8x64xbf16> to vector<8x64xbf16>
    %c0_2 = arith.constant 0 : index
    %c0_3 = arith.constant 0 : index
    %c0_4 = arith.constant 0 : index
    %2 = vector.load %arg2[%c0_2, %c0_3, %c0_4] : memref<1x4x480xbf16, #tpu.memory_space<vmem>>, vector<1x4x480xbf16>
    %3 = vector.shape_cast %2 : vector<1x4x480xbf16> to vector<4x480xbf16>
    %c0_5 = arith.constant 0 : index
    %c0_6 = arith.constant 0 : index
    %4 = vector.load %arg4[%c0_5, %c0_6] : memref<16x8xbf16, #tpu.memory_space<vmem>>, vector<16x8xbf16>
    %cst = arith.constant dense<0.000000e+00> : vector<16x64xf32>
    %5 = tpu.matmul %4, %1, %cst {dimension_numbers = #tpu.dot_dimension_numbers<[1], [0], [0], [1], [0, 0, 1, 1], [], []>} : vector<16x8xbf16>, vector<8x64xbf16>, vector<16x64xf32> -> vector<16x64xf32>
    %6 = vector.extract_strided_slice %5 {offsets = [0, 0], sizes = [4, 64], strides = [1, 1]} : vector<16x64xf32> to vector<4x64xf32>
    %7 = vector.extract_strided_slice %5 {offsets = [4, 0], sizes = [4, 64], strides = [1, 1]} : vector<16x64xf32> to vector<4x64xf32>
    %8 = vector.extract_strided_slice %5 {offsets = [8, 0], sizes = [4, 64], strides = [1, 1]} : vector<16x64xf32> to vector<4x64xf32>
    %9 = vector.extract_strided_slice %5 {offsets = [12, 0], sizes = [4, 64], strides = [1, 1]} : vector<16x64xf32> to vector<4x64xf32>
    %10 = tpu.concatenate %6, %7, %8, %9 in 1 : vector<4x64xf32>, vector<4x64xf32>, vector<4x64xf32>, vector<4x64xf32> -> vector<4x256xf32>
    %c0_7 = arith.constant 0 : index
    %c0_8 = arith.constant 0 : index
    %11 = vector.load %arg3[%c0_7, %c0_8] : memref<256x400xf32, #tpu.memory_space<vmem>>, vector<256x400xf32>
    %cst_9 = arith.constant dense<0.000000e+00> : vector<4x400xf32>
    %12 = tpu.matmul %10, %11, %cst_9 {dimension_numbers = #tpu.dot_dimension_numbers<[1], [0], [0], [1], [0, 0, 1, 1], [], []>} : vector<4x256xf32>, vector<256x400xf32>, vector<4x400xf32> -> vector<4x400xf32>
    %c0_10 = arith.constant 0 : index
    %c0_11 = arith.constant 0 : index
    %c0_12 = arith.constant 0 : index
    %13 = vector.load %arg7[%c0_10, %c0_11, %c0_12] : memref<5x4x1xf32, #tpu.memory_space<vmem>>, vector<1x4x1xf32>
    %14 = vector.shape_cast %13 : vector<1x4x1xf32> to vector<4x1xf32>
    %15 = vector.broadcast %14 : vector<4x1xf32> to vector<4x400xf32>
    %16 = arith.addf %12, %15 : vector<4x400xf32>
    %cst_13 = arith.constant 0.000000e+00 : f32
    %17 = vector.broadcast %cst_13 : f32 to vector<4x400xf32>
    %18 = arith.maximumf %16, %17 : vector<4x400xf32>
    %19 = arith.truncf %18 : vector<4x400xf32> to vector<4x400xbf16>
    %20 = vector.extract_strided_slice %19 {offsets = [0, 0], sizes = [4, 344], strides = [1, 1]} : vector<4x400xbf16> to vector<4x344xbf16>
    %21 = vector.extract_strided_slice %3 {offsets = [0, 50], sizes = [4, 344], strides = [1, 1]} : vector<4x480xbf16> to vector<4x344xbf16>
    %22 = vector.extract_strided_slice %19 {offsets = [0, 1], sizes = [4, 344], strides = [1, 1]} : vector<4x400xbf16> to vector<4x344xbf16>
    %23 = vector.extract_strided_slice %3 {offsets = [0, 51], sizes = [4, 344], strides = [1, 1]} : vector<4x480xbf16> to vector<4x344xbf16>
    %24 = vector.extract_strided_slice %19 {offsets = [0, 2], sizes = [4, 344], strides = [1, 1]} : vector<4x400xbf16> to vector<4x344xbf16>
    %25 = vector.extract_strided_slice %3 {offsets = [0, 52], sizes = [4, 344], strides = [1, 1]} : vector<4x480xbf16> to vector<4x344xbf16>
    %26 = vector.extract_strided_slice %19 {offsets = [0, 24], sizes = [4, 344], strides = [1, 1]} : vector<4x400xbf16> to vector<4x344xbf16>
    %27 = vector.extract_strided_slice %3 {offsets = [0, 74], sizes = [4, 344], strides = [1, 1]} : vector<4x480xbf16> to vector<4x344xbf16>
    %28 = vector.extract_strided_slice %19 {offsets = [0, 25], sizes = [4, 344], strides = [1, 1]} : vector<4x400xbf16> to vector<4x344xbf16>
    %29 = vector.extract_strided_slice %3 {offsets = [0, 75], sizes = [4, 344], strides = [1, 1]} : vector<4x480xbf16> to vector<4x344xbf16>
    %30 = vector.extract_strided_slice %19 {offsets = [0, 26], sizes = [4, 344], strides = [1, 1]} : vector<4x400xbf16> to vector<4x344xbf16>
    %31 = vector.extract_strided_slice %3 {offsets = [0, 76], sizes = [4, 344], strides = [1, 1]} : vector<4x480xbf16> to vector<4x344xbf16>
    %32 = vector.extract_strided_slice %19 {offsets = [0, 48], sizes = [4, 344], strides = [1, 1]} : vector<4x400xbf16> to vector<4x344xbf16>
    %33 = vector.extract_strided_slice %3 {offsets = [0, 98], sizes = [4, 344], strides = [1, 1]} : vector<4x480xbf16> to vector<4x344xbf16>
    %34 = vector.extract_strided_slice %19 {offsets = [0, 49], sizes = [4, 344], strides = [1, 1]} : vector<4x400xbf16> to vector<4x344xbf16>
    %35 = vector.extract_strided_slice %3 {offsets = [0, 99], sizes = [4, 344], strides = [1, 1]} : vector<4x480xbf16> to vector<4x344xbf16>
    %36 = vector.extract_strided_slice %19 {offsets = [0, 50], sizes = [4, 344], strides = [1, 1]} : vector<4x400xbf16> to vector<4x344xbf16>
    %37 = vector.extract_strided_slice %3 {offsets = [0, 100], sizes = [4, 344], strides = [1, 1]} : vector<4x480xbf16> to vector<4x344xbf16>
    %38 = tpu.concatenate %20, %21, %22, %23, %24, %25, %26, %27, %28, %29, %30, %31, %32, %33, %34, %35 in 0 : vector<4x344xbf16>, vector<4x344xbf16>, vector<4x344xbf16>, vector<4x344xbf16>, vector<4x344xbf16>, vector<4x344xbf16>, vector<4x344xbf16>, vector<4x344xbf16>, vector<4x344xbf16>, vector<4x344xbf16>, vector<4x344xbf16>, vector<4x344xbf16>, vector<4x344xbf16>, vector<4x344xbf16>, vector<4x344xbf16>, vector<4x344xbf16> -> vector<64x344xbf16>
    %39 = tpu.concatenate %36, %37 in 0 : vector<4x344xbf16>, vector<4x344xbf16> -> vector<8x344xbf16>
    %40 = tpu.concatenate %38, %39 in 0 : vector<64x344xbf16>, vector<8x344xbf16> -> vector<72x344xbf16>
    %c0_14 = arith.constant 0 : index
    %c0_15 = arith.constant 0 : index
    %41 = vector.load %arg5[%c0_14, %c0_15] : memref<4x72xbf16, #tpu.memory_space<vmem>>, vector<4x72xbf16>
    %cst_16 = arith.constant dense<0.000000e+00> : vector<4x344xf32>
    %42 = tpu.matmul %41, %40, %cst_16 {dimension_numbers = #tpu.dot_dimension_numbers<[1], [0], [0], [1], [0, 0, 1, 1], [], []>} : vector<4x72xbf16>, vector<72x344xbf16>, vector<4x344xf32> -> vector<4x344xf32>
    %c1 = arith.constant 1 : index
    %c0_17 = arith.constant 0 : index
    %c0_18 = arith.constant 0 : index
    %43 = vector.load %arg7[%c1, %c0_17, %c0_18] : memref<5x4x1xf32, #tpu.memory_space<vmem>>, vector<1x4x1xf32>
    %44 = vector.shape_cast %43 : vector<1x4x1xf32> to vector<4x1xf32>
    %45 = vector.broadcast %44 : vector<4x1xf32> to vector<4x344xf32>
    %46 = arith.addf %42, %45 : vector<4x344xf32>
    %cst_19 = arith.constant 0.000000e+00 : f32
    %47 = vector.broadcast %cst_19 : f32 to vector<4x344xf32>
    %48 = arith.maximumf %46, %47 : vector<4x344xf32>
    %c0_20 = arith.constant 0 : index
    %c0_21 = arith.constant 0 : index
    %49 = vector.load %arg8[%c0_20, %c0_21] : memref<2x400xf32, #tpu.memory_space<vmem>>, vector<1x344xf32>
    %c1_22 = arith.constant 1 : index
    %c0_23 = arith.constant 0 : index
    %50 = vector.load %arg8[%c1_22, %c0_23] : memref<2x400xf32, #tpu.memory_space<vmem>>, vector<1x344xf32>
    %cst_24 = arith.constant 0.000000e+00 : f32
    %51 = vector.broadcast %cst_24 : f32 to vector<4x3xf32>
    %cst_25 = arith.constant 0.000000e+00 : f32
    %52 = vector.broadcast %cst_25 : f32 to vector<4x1xf32>
    %53 = tpu.concatenate %51, %48, %52 in 1 : vector<4x3xf32>, vector<4x344xf32>, vector<4x1xf32> -> vector<4x348xf32>
    %54 = vector.extract_strided_slice %53 {offsets = [0, 0], sizes = [4, 344], strides = [1, 1]} : vector<4x348xf32> to vector<4x344xf32>
    %55 = vector.extract_strided_slice %53 {offsets = [0, 2], sizes = [4, 344], strides = [1, 1]} : vector<4x348xf32> to vector<4x344xf32>
    %56 = vector.extract_strided_slice %53 {offsets = [0, 4], sizes = [4, 344], strides = [1, 1]} : vector<4x348xf32> to vector<4x344xf32>
    %57 = arith.subf %56, %55 : vector<4x344xf32>
    %58 = vector.broadcast %49 : vector<1x344xf32> to vector<4x344xf32>
    %59 = arith.mulf %58, %57 : vector<4x344xf32>
    %60 = arith.addf %55, %59 : vector<4x344xf32>
    %61 = arith.subf %54, %55 : vector<4x344xf32>
    %62 = vector.broadcast %50 : vector<1x344xf32> to vector<4x344xf32>
    %63 = arith.mulf %62, %61 : vector<4x344xf32>
    %64 = arith.addf %60, %63 : vector<4x344xf32>
    %65 = arith.truncf %64 : vector<4x344xf32> to vector<4x344xbf16>
    %66 = vector.extract_strided_slice %65 {offsets = [0, 0], sizes = [4, 288], strides = [1, 1]} : vector<4x344xbf16> to vector<4x288xbf16>
    %67 = vector.extract_strided_slice %65 {offsets = [0, 1], sizes = [4, 288], strides = [1, 1]} : vector<4x344xbf16> to vector<4x288xbf16>
    %68 = vector.extract_strided_slice %65 {offsets = [0, 2], sizes = [4, 288], strides = [1, 1]} : vector<4x344xbf16> to vector<4x288xbf16>
    %69 = vector.extract_strided_slice %65 {offsets = [0, 24], sizes = [4, 288], strides = [1, 1]} : vector<4x344xbf16> to vector<4x288xbf16>
    %70 = vector.extract_strided_slice %65 {offsets = [0, 25], sizes = [4, 288], strides = [1, 1]} : vector<4x344xbf16> to vector<4x288xbf16>
    %71 = vector.extract_strided_slice %65 {offsets = [0, 26], sizes = [4, 288], strides = [1, 1]} : vector<4x344xbf16> to vector<4x288xbf16>
    %72 = vector.extract_strided_slice %65 {offsets = [0, 48], sizes = [4, 288], strides = [1, 1]} : vector<4x344xbf16> to vector<4x288xbf16>
    %73 = vector.extract_strided_slice %65 {offsets = [0, 49], sizes = [4, 288], strides = [1, 1]} : vector<4x344xbf16> to vector<4x288xbf16>
    %74 = vector.extract_strided_slice %65 {offsets = [0, 50], sizes = [4, 288], strides = [1, 1]} : vector<4x344xbf16> to vector<4x288xbf16>
    %75 = tpu.concatenate %66, %67, %68, %69, %70, %71, %72, %73, %74 in 0 : vector<4x288xbf16>, vector<4x288xbf16>, vector<4x288xbf16>, vector<4x288xbf16>, vector<4x288xbf16>, vector<4x288xbf16>, vector<4x288xbf16>, vector<4x288xbf16>, vector<4x288xbf16> -> vector<36x288xbf16>
    %c0_26 = arith.constant 0 : index
    %c0_27 = arith.constant 0 : index
    %76 = vector.load %arg6[%c0_26, %c0_27] : memref<4x36xbf16, #tpu.memory_space<vmem>>, vector<4x36xbf16>
    %cst_28 = arith.constant dense<0.000000e+00> : vector<4x288xf32>
    %77 = tpu.matmul %76, %75, %cst_28 {dimension_numbers = #tpu.dot_dimension_numbers<[1], [0], [0], [1], [0, 0, 1, 1], [], []>} : vector<4x36xbf16>, vector<36x288xbf16>, vector<4x288xf32> -> vector<4x288xf32>
    %c2 = arith.constant 2 : index
    %c0_29 = arith.constant 0 : index
    %c0_30 = arith.constant 0 : index
    %78 = vector.load %arg7[%c2, %c0_29, %c0_30] : memref<5x4x1xf32, #tpu.memory_space<vmem>>, vector<1x4x1xf32>
    %79 = vector.shape_cast %78 : vector<1x4x1xf32> to vector<4x1xf32>
    %80 = vector.broadcast %79 : vector<4x1xf32> to vector<4x288xf32>
    %81 = arith.addf %77, %80 : vector<4x288xf32>
    %cst_31 = arith.constant 0.000000e+00 : f32
    %82 = vector.broadcast %cst_31 : f32 to vector<4x288xf32>
    %83 = arith.maximumf %81, %82 : vector<4x288xf32>
    %c0_32 = arith.constant 0 : index
    %c0_33 = arith.constant 0 : index
    %84 = vector.load %arg8[%c0_32, %c0_33] : memref<2x400xf32, #tpu.memory_space<vmem>>, vector<1x288xf32>
    %c1_34 = arith.constant 1 : index
    %c0_35 = arith.constant 0 : index
    %85 = vector.load %arg8[%c1_34, %c0_35] : memref<2x400xf32, #tpu.memory_space<vmem>>, vector<1x288xf32>
    %cst_36 = arith.constant 0.000000e+00 : f32
    %86 = vector.broadcast %cst_36 : f32 to vector<4x3xf32>
    %cst_37 = arith.constant 0.000000e+00 : f32
    %87 = vector.broadcast %cst_37 : f32 to vector<4x1xf32>
    %88 = tpu.concatenate %86, %83, %87 in 1 : vector<4x3xf32>, vector<4x288xf32>, vector<4x1xf32> -> vector<4x292xf32>
    %89 = vector.extract_strided_slice %88 {offsets = [0, 0], sizes = [4, 288], strides = [1, 1]} : vector<4x292xf32> to vector<4x288xf32>
    %90 = vector.extract_strided_slice %88 {offsets = [0, 2], sizes = [4, 288], strides = [1, 1]} : vector<4x292xf32> to vector<4x288xf32>
    %91 = vector.extract_strided_slice %88 {offsets = [0, 4], sizes = [4, 288], strides = [1, 1]} : vector<4x292xf32> to vector<4x288xf32>
    %92 = arith.subf %91, %90 : vector<4x288xf32>
    %93 = vector.broadcast %84 : vector<1x288xf32> to vector<4x288xf32>
    %94 = arith.mulf %93, %92 : vector<4x288xf32>
    %95 = arith.addf %90, %94 : vector<4x288xf32>
    %96 = arith.subf %89, %90 : vector<4x288xf32>
    %97 = vector.broadcast %85 : vector<1x288xf32> to vector<4x288xf32>
    %98 = arith.mulf %97, %96 : vector<4x288xf32>
    %99 = arith.addf %95, %98 : vector<4x288xf32>
    %c3 = arith.constant 3 : index
    %c0_38 = arith.constant 0 : index
    %c0_39 = arith.constant 0 : index
    %100 = vector.load %arg7[%c3, %c0_38, %c0_39] : memref<5x4x1xf32, #tpu.memory_space<vmem>>, vector<1x4x1xf32>
    %101 = vector.shape_cast %100 : vector<1x4x1xf32> to vector<4x1xf32>
    %102 = vector.broadcast %101 : vector<4x1xf32> to vector<4x288xf32>
    %103 = arith.mulf %99, %102 : vector<4x288xf32>
    %c4 = arith.constant 4 : index
    %c0_40 = arith.constant 0 : index
    %c0_41 = arith.constant 0 : index
    %104 = vector.load %arg7[%c4, %c0_40, %c0_41] : memref<5x4x1xf32, #tpu.memory_space<vmem>>, vector<1x4x1xf32>
    %105 = vector.shape_cast %104 : vector<1x4x1xf32> to vector<4x1xf32>
    %106 = vector.broadcast %105 : vector<4x1xf32> to vector<4x288xf32>
    %107 = arith.addf %103, %106 : vector<4x288xf32>
    %c0_42 = arith.constant 0 : index
    %c0_43 = arith.constant 0 : index
    %c0_44 = arith.constant 0 : index
    %108 = vector.load %arg9[%c0_42, %c0_43, %c0_44] : memref<1x4x288xf32, #tpu.memory_space<vmem>>, vector<1x4x288xf32>
    %109 = vector.shape_cast %108 : vector<1x4x288xf32> to vector<4x288xf32>
    %110 = vector.shape_cast %107 : vector<4x288xf32> to vector<1x4x288xf32>
    tpu.vector_store %arg9[%c0_42, %c0_43, %c0_44], %110 {strides = array<i32>} : memref<1x4x288xf32, #tpu.memory_space<vmem>>, vector<1x4x288xf32>,
    return
  }
  func.func @transform_0(%arg0: i32) -> (i32, i32, i32) {
    %c0_i32 = arith.constant 0 : i32
    %c0_i32_0 = arith.constant 0 : i32
    %c0_i32_1 = arith.constant 0 : i32
    return %arg0, %c0_i32, %c0_i32_0 : i32, i32, i32
  }
  func.func @transform_1(%arg0: i32) -> (i32, i32, i32) {
    %c0_i32 = arith.constant 0 : i32
    %c0_i32_0 = arith.constant 0 : i32
    %c0_i32_1 = arith.constant 0 : i32
    return %arg0, %c0_i32, %c0_i32_0 : i32, i32, i32
  }
  func.func @transform_2(%arg0: i32) -> (i32, i32) {
    %c0_i32 = arith.constant 0 : i32
    %c0_i32_0 = arith.constant 0 : i32
    %c0_i32_1 = arith.constant 0 : i32
    return %c0_i32, %c0_i32_0 : i32, i32
  }
  func.func @transform_3(%arg0: i32) -> (i32, i32) {
    %c0_i32 = arith.constant 0 : i32
    %c0_i32_0 = arith.constant 0 : i32
    %c0_i32_1 = arith.constant 0 : i32
    return %c0_i32, %c0_i32_0 : i32, i32
  }
  func.func @transform_4(%arg0: i32) -> (i32, i32) {
    %c0_i32 = arith.constant 0 : i32
    %c0_i32_0 = arith.constant 0 : i32
    %c0_i32_1 = arith.constant 0 : i32
    return %c0_i32, %c0_i32_0 : i32, i32
  }
  func.func @transform_5(%arg0: i32) -> (i32, i32) {
    %c0_i32 = arith.constant 0 : i32
    %c0_i32_0 = arith.constant 0 : i32
    %c0_i32_1 = arith.constant 0 : i32
    return %c0_i32, %c0_i32_0 : i32, i32
  }
  func.func @transform_6(%arg0: i32) -> (i32, i32, i32) {
    %c0_i32 = arith.constant 0 : i32
    %c0_i32_0 = arith.constant 0 : i32
    %c0_i32_1 = arith.constant 0 : i32
    %c0_i32_2 = arith.constant 0 : i32
    return %c0_i32, %c0_i32_0, %c0_i32_1 : i32, i32, i32
  }
  func.func @transform_7(%arg0: i32) -> (i32, i32) {
    %c0_i32 = arith.constant 0 : i32
    %c0_i32_0 = arith.constant 0 : i32
    %c0_i32_1 = arith.constant 0 : i32
    return %c0_i32, %c0_i32_0 : i32, i32
  }
  func.func @transform_8(%arg0: i32) -> (i32, i32, i32) {
    %c0_i32 = arith.constant 0 : i32
    %c0_i32_0 = arith.constant 0 : i32
    %c0_i32_1 = arith.constant 0 : i32
    return %arg0, %c0_i32, %c0_i32_0 : i32, i32, i32
  }
}

</mosaic_0001>

<bundles_post_ra>
// kernel: expanding_path_forward.1
= control target key start
LH: loop header
LB: loop body
LE: loop exit
PB: predicated region body
PF: predicated region fallthrough
CT: control target
= control target key end

     0   :  { %s1884_s27 = smov 0   ;;  %s2821_s0 = inlined_call_operand.vmem [shape: bf16[2,8,64], index: 0, kind: input, shape index: {}]   ;;  %s2822_s1 = inlined_call_operand.vmem [shape: bf16[2,4,480], index: 1, kind: input, shape index: {}]   ;;  %s2823_s2 = inlined_call_operand.vmem [shape: f32[256,400], index: 2, kind: input, shape index: {}]   ;;  %s2824_s3 = inlined_call_operand.vmem [shape: bf16[16,8], index: 3, kind: input, shape index: {}]   ;;  %s2825_s4 = inlined_call_operand.vmem [shape: bf16[4,72], index: 4, kind: input, shape index: {}]   ;;  %s2826_s5 = inlined_call_operand.vmem [shape: bf16[4,36], index: 5, kind: input, shape index: {}]   ;;  %s2827_s6 = inlined_call_operand.vmem [shape: f32[5,4,1], index: 6, kind: input, shape index: {}]   ;;  %s2828_s7 = inlined_call_operand.vmem [shape: f32[2,400], index: 7, kind: input, shape index: {}]   ;;  %s2829_s8 = inlined_call_operand.vmem [shape: f32[2,4,288], index: 8, kind: output, shape index: {}]  }
   0x1 LB: > { %s1700_s28 = sadd.s32 4294967295, %s1814_s27   ;;  %p1704_p0 = scmp.ge.s32.totalorder %s1814_s27, 1  ;;  %s1814_s27 = sphi %s1884_s27, %s18_s27  }
   0x2   : > { %p271_p1 = scmp.lt.s32.totalorder %s1814_s27, 3 }
   0x4   : > { %p272_p2 = pnand %p1704_p0, %p271_p1 }
   0x5   : > { %p309_p3 = scmp.lt.s32.totalorder (!%p272_p2), %s1700_s28, 1  ;;  %s1821_s14 = smov (!%p272_p2), 64  }
   0x6   : > { %275 = sbr.rel (%p272_p2) target bundleno = 2512 (0x9d0), region = 52  ;;  %s1822_s17 = smov (!%p272_p2), 30  }
   0x7   : > { %s1823_s18 = smov (!%p272_p2), 29   ;;  %s1824_s19 = smov (!%p272_p2), 53  }
   0x8   : > { %s1825_s20 = smov (!%p272_p2), 52   ;;  %s1826_s21 = smov (!%p272_p2), 76  }
   0x9   : > { %s1827_s22 = smov (!%p272_p2), 54   ;;  %s1828_s23 = smov (!%p272_p2), 80  }
   0xa   : > { %s1829_s24 = smov (!%p272_p2), 103   ;;  %s1830_s25 = smov (!%p272_p2), 126  }
   0xb   : > { %v1816_v0 = vmov 0.0   ;;  %s2831_s28 = smov (!%p309_p3, %s1700_s28), 1  ;;  %vm1817_vm0 = vmmov 0   ;;  %vm337_vm1 = vcmask 1043456   ;;  %v1807_v3 = vld [vmem:[%s2824_s3] sm:$0xff]   ;;  %vm333_vm2 = vcmask 64512  }
   0xc   : > { %1737 = vmatprep.subr.bf16.mxu0 %v1816_v0  ;;  %1739 = vmatprep.mubr.msk.bf16.mxu0 %vm1817_vm0, %v1816_v0  ;;  %s1705_s29 = sshll.u32 %s2831_s28, 2  ;;  %v456_v4 = vld [vmem:[%s2823_s2 + $0x1e8] sm:$0xff]  ;;  %v458_v5 = vld [vmem:[%s2823_s2 + $0x1f8] sm:$0xff]  ;;  %v455_v6 = vld [vmem:[%s2823_s2 + $0x1e0] sm:$0xff]  ;;  %s1724_s13 = sshll.u32 %s2831_s28, 3  ;;  %vm392_vm3 = vcmask 523264  }
   0xd   : > { %s312_s10 = scalar_lea.vmem %s2821_s0, %s1705_s29  ;;  %529 = vmatprep.subr.mxu1 %v456_v4  ;;  %v457_v7 = vld [vmem:[%s2823_s2 + $0x1f0] sm:$0xff]  ;;  %v452_v8 = vld [vmem:[%s2823_s2 + $0x1c8] sm:$0xff]  ;;  %v454_v9 = vld [vmem:[%s2823_s2 + $0x1d8] sm:$0xff]  ;;  %s317_s16 = scalar_lea.vmem %s2822_s1, %s1724_s13  ;;  %vm705_vm4 = vcmask 637952   ;;  %vm872_vm5 = vcmask 1041408   ;;  %vm831_vm6 = vcmask 654336  }
   0xe   : > { %v324_v1 = vld [vmem:[%s312_s10] sm:$0xf]  ;;  %530 = vmatpush1.msra.mxu1 %v455_v6  ;;  %v453_v11 = vld [vmem:[%s2823_s2 + $0x1d0] sm:$0xff]  ;;  %v448_v12 = vld [vmem:[%s2823_s2 + $0x1a8] sm:$0xff]  ;;  %s1820_s13 = smov 78   ;;  %s1831_s26 = smov 79  }
   0xf   : > { %v339_v2 = vsel %vm337_vm1, %v324_v1, 0  ;;  %v451_v10 = vld [vmem:[%s2823_s2 + $0x1c0] sm:$0xff]  ;;  %531 = vmatprep.subr.mxu1 %v452_v8  ;;  %v450_v13 = vld [vmem:[%s2823_s2 + $0x1b8] sm:$0xff]  ;;  %v449_v15 = vld [vmem:[%s2823_s2 + $0x1b0] sm:$0xff]  ;;  %s1832_s29 = smov 102   ;;  %s1833_s30 = smov 104  }
  0x10   : > { %1738 = vmatpush3.bf16.msra.mxu0 %v339_v2  ;;  %v447_v14 = vld [vmem:[%s2823_s2 + $0x1a0] sm:$0xff]  ;;  %532 = vmatpush1.msra.mxu1 %v451_v10  ;;  %v444_v16 = vld [vmem:[%s2823_s2 + $0x188] sm:$0xff]  ;;  %v446_v17 = vld [vmem:[%s2823_s2 + $0x198] sm:$0xff]  ;;  %s1834_s9 = smov 77   ;;  %s1835_s10 = smov 127   ;;  %vm843_vm7 = vcmask 244736  }
  0x11   : > { %600 = vmatprep.subr.mxu0 %v458_v5  ;;  %533 = vmatprep.subr.mxu1 %v448_v12  ;;  %v443_v18 = vld [vmem:[%s2823_s2 + $0x180] sm:$0xff]  ;;  %v445_v19 = vld [vmem:[%s2823_s2 + $0x190] sm:$0xff]  ;;  %v440_v20 = vld [vmem:[%s2823_s2 + $0x168] sm:$0xff]  ;;  %vm868_vm8 = vcmask 236544   ;;  %vm856_vm9 = vcmask 646144   ;;  %vm888_vm10 = vcmask 1045504  }
  0x12   : > { %534 = vmatpush1.msra.mxu1 %v447_v14  ;;  %v442_v21 = vld [vmem:[%s2823_s2 + $0x178] sm:$0xff]  ;;  %v439_v22 = vld [vmem:[%s2823_s2 + $0x160] sm:$0xff]  ;;  %v441_v23 = vld [vmem:[%s2823_s2 + $0x170] sm:$0xff]  ;;  %vm797_vm11 = vcmask 433152   ;;  %vm818_vm12 = vcmask 424960   ;;  %vm755_vm13 = vcmask 621568  }
  0x13   : > { %1740 = vmatmul.mubr.msk.bf16.vlgmr.msra.gmra.mxu0 %vm333_vm2, %v1807_v3  ;;  %535 = vmatprep.subr.mxu1 %v444_v16  ;;  %v436_v24 = vld [vmem:[%s2823_s2 + $0x148] sm:$0xff]  ;;  %v438_v25 = vld [vmem:[%s2823_s2 + $0x158] sm:$0xff]  ;;  %v435_v26 = vld [vmem:[%s2823_s2 + $0x140] sm:$0xff]  ;;  %vm776_vm14 = vcmask 441344   ;;  %vm786_vm15 = vcmask 842752   ;;  %vm744_vm2 = vcmask 1031168  }
  0x14   : > { %601 = vmatpush1.msra.mxu0 %v457_v7  ;;  %536 = vmatpush1.msra.mxu1 %v443_v18  ;;  %v437_v27 = vld [vmem:[%s2823_s2 + $0x150] sm:$0xff]  ;;  %v432_v28 = vld [vmem:[%s2823_s2 + $0x128] sm:$0xff]  ;;  %v434_v29 = vld [vmem:[%s2823_s2 + $0x138] sm:$0xff]  ;;  %s1767_s11 = smul.u32 12, %s2831_s28 }
  0x15   : > { %602 = vmatprep.subr.mxu0 %v454_v9  ;;  %537 = vmatprep.subr.mxu1 %v440_v20  ;;  %v431_v30 = vld [vmem:[%s2823_s2 + $0x120] sm:$0xff]  ;;  %v433_v31 = vld [vmem:[%s2823_s2 + $0x130] sm:$0xff]  ;;  %v428_v32 = vld [vmem:[%s2823_s2 + $0x108] sm:$0xff] }
  0x16   : > { %603 = vmatpush1.msra.mxu0 %v453_v11  ;;  %538 = vmatpush1.msra.mxu1 %v439_v22  ;;  %v430_v33 = vld [vmem:[%s2823_s2 + $0x118] sm:$0xff]  ;;  %v427_v34 = vld [vmem:[%s2823_s2 + $0x100] sm:$0xff]  ;;  %v429_v35 = vld [vmem:[%s2823_s2 + $0x110] sm:$0xff]  ;;  %s322_s15 = scalar_lea.vmem %s2829_s8, %s1767_s11 }
  0x17   : > { %604 = vmatprep.subr.mxu0 %v450_v13  ;;  %539 = vmatprep.subr.mxu1 %v436_v24  ;;  %v424_v36 = vld [vmem:[%s2823_s2 + $0xe8] sm:$0xff]  ;;  %v426_v37 = vld [vmem:[%s2823_s2 + $0xf8] sm:$0xff]  ;;  %v423_v38 = vld [vmem:[%s2823_s2 + $0xe0] sm:$0xff] }
  0x18   : > { %605 = vmatpush1.msra.mxu0 %v449_v15  ;;  %540 = vmatpush1.msra.mxu1 %v435_v26  ;;  %v425_v39 = vld [vmem:[%s2823_s2 + $0xf0] sm:$0xff]  ;;  %v420_v40 = vld [vmem:[%s2823_s2 + $0xc8] sm:$0xff]  ;;  %v422_v41 = vld [vmem:[%s2823_s2 + $0xd8] sm:$0xff] }
  0x19   : > { %606 = vmatprep.subr.mxu0 %v446_v17  ;;  %541 = vmatprep.subr.mxu1 %v432_v28  ;;  %v419_v42 = vld [vmem:[%s2823_s2 + $0xc0] sm:$0xff]  ;;  %v421_v43 = vld [vmem:[%s2823_s2 + $0xd0] sm:$0xff]  ;;  %v416_v44 = vld [vmem:[%s2823_s2 + $0xa8] sm:$0xff] }
  0x1a   : > { %607 = vmatpush1.msra.mxu0 %v445_v19  ;;  %542 = vmatpush1.msra.mxu1 %v431_v30  ;;  %v418_v45 = vld [vmem:[%s2823_s2 + $0xb8] sm:$0xff]  ;;  %v415_v46 = vld [vmem:[%s2823_s2 + $0xa0] sm:$0xff]  ;;  %v417_v47 = vld [vmem:[%s2823_s2 + $0xb0] sm:$0xff] }
  0x1b   : > { %608 = vmatprep.subr.mxu0 %v442_v21  ;;  %543 = vmatprep.subr.mxu1 %v428_v32  ;;  %v412_v48 = vld [vmem:[%s2823_s2 + $0x88] sm:$0xff]  ;;  %v414_v49 = vld [vmem:[%s2823_s2 + $0x98] sm:$0xff]  ;;  %v411_v50 = vld [vmem:[%s2823_s2 + $0x80] sm:$0xff] }
  0x1c   : > { %609 = vmatpush1.msra.mxu0 %v441_v23  ;;  %544 = vmatpush1.msra.mxu1 %v427_v34  ;;  %v413_v51 = vld [vmem:[%s2823_s2 + $0x90] sm:$0xff]  ;;  %v408_v52 = vld [vmem:[%s2823_s2 + $0x68] sm:$0xff]  ;;  %v410_v53 = vld [vmem:[%s2823_s2 + $0x78] sm:$0xff] }
  0x1d   : > { %610 = vmatprep.subr.mxu0 %v438_v25  ;;  %545 = vmatprep.subr.mxu1 %v424_v36  ;;  %v407_v54 = vld [vmem:[%s2823_s2 + $0x60] sm:$0xff]  ;;  %v409_v55 = vld [vmem:[%s2823_s2 + $0x70] sm:$0xff]  ;;  %v404_v56 = vld [vmem:[%s2823_s2 + $0x48] sm:$0xff] }
  0x1e   : > { %611 = vmatpush1.msra.mxu0 %v437_v27  ;;  %546 = vmatpush1.msra.mxu1 %v423_v38  ;;  %v406_v57 = vld [vmem:[%s2823_s2 + $0x58] sm:$0xff]  ;;  %v403_v58 = vld [vmem:[%s2823_s2 + $0x40] sm:$0xff]  ;;  %v405_v59 = vld [vmem:[%s2823_s2 + $0x50] sm:$0xff] }
  0x1f   : > { %612 = vmatprep.subr.mxu0 %v434_v29  ;;  %547 = vmatprep.subr.mxu1 %v420_v40  ;;  %v400_v60 = vld [vmem:[%s2823_s2 + $0x28] sm:$0xff]  ;;  %v402_v61 = vld [vmem:[%s2823_s2 + $0x38] sm:$0xff]  ;;  %v399_v62 = vld [vmem:[%s2823_s2 + $0x20] sm:$0xff] }
  0x20   : > { %613 = vmatpush1.msra.mxu0 %v433_v31  ;;  %548 = vmatpush1.msra.mxu1 %v419_v42  ;;  %v401_v63 = vld [vmem:[%s2823_s2 + $0x30] sm:$0xff]  ;;  %v396_v1 = vld [vmem:[%s2823_s2 + $0x8] sm:$0xff]  ;;  %v398_v2 = vld [vmem:[%s2823_s2 + $0x18] sm:$0xff] }
  0x21   : > { %614 = vmatprep.subr.mxu0 %v430_v33  ;;  %549 = vmatprep.subr.mxu1 %v416_v44  ;;  %v395_v3 = vld [vmem:[%s2823_s2] sm:$0xff]  ;;  %v397_v4 = vld [vmem:[%s2823_s2 + $0x10] sm:$0xff]  ;;  %v520_v5 = vld [vmem:[%s2823_s2 + $0x3e8] sm:$0xff] }
  0x22   : > { %615 = vmatpush1.msra.mxu0 %v429_v35  ;;  %550 = vmatpush1.msra.mxu1 %v415_v46  ;;  %v522_v6 = vld [vmem:[%s2823_s2 + $0x3f8] sm:$0xff]  ;;  %v519_v7 = vld [vmem:[%s2823_s2 + $0x3e0] sm:$0xff]  ;;  %v521_v8 = vld [vmem:[%s2823_s2 + $0x3f0] sm:$0xff] }
  0x23   : > { %616 = vmatprep.subr.mxu0 %v426_v37  ;;  %551 = vmatprep.subr.mxu1 %v412_v48  ;;  %v516_v9 = vld [vmem:[%s2823_s2 + $0x3c8] sm:$0xff]  ;;  %v518_v10 = vld [vmem:[%s2823_s2 + $0x3d8] sm:$0xff]  ;;  %v515_v11 = vld [vmem:[%s2823_s2 + $0x3c0] sm:$0xff] }
  0x24   : > { %617 = vmatpush1.msra.mxu0 %v425_v39  ;;  %552 = vmatpush1.msra.mxu1 %v411_v50  ;;  %v517_v12 = vld [vmem:[%s2823_s2 + $0x3d0] sm:$0xff]  ;;  %v512_v13 = vld [vmem:[%s2823_s2 + $0x3a8] sm:$0xff]  ;;  %v514_v14 = vld [vmem:[%s2823_s2 + $0x3b8] sm:$0xff] }
  0x25   : > { %618 = vmatprep.subr.mxu0 %v422_v41  ;;  %553 = vmatprep.subr.mxu1 %v408_v52  ;;  %v511_v15 = vld [vmem:[%s2823_s2 + $0x3a0] sm:$0xff]  ;;  %v513_v16 = vld [vmem:[%s2823_s2 + $0x3b0] sm:$0xff]  ;;  %v508_v17 = vld [vmem:[%s2823_s2 + $0x388] sm:$0xff] }
  0x26   : > { %619 = vmatpush1.msra.mxu0 %v421_v43  ;;  %554 = vmatpush1.msra.mxu1 %v407_v54  ;;  %v510_v18 = vld [vmem:[%s2823_s2 + $0x398] sm:$0xff]  ;;  %v507_v19 = vld [vmem:[%s2823_s2 + $0x380] sm:$0xff]  ;;  %v509_v20 = vld [vmem:[%s2823_s2 + $0x390] sm:$0xff] }
  0x27   : > { %620 = vmatprep.subr.mxu0 %v418_v45  ;;  %555 = vmatprep.subr.mxu1 %v404_v56  ;;  %v504_v21 = vld [vmem:[%s2823_s2 + $0x368] sm:$0xff]  ;;  %v506_v22 = vld [vmem:[%s2823_s2 + $0x378] sm:$0xff]  ;;  %v503_v23 = vld [vmem:[%s2823_s2 + $0x360] sm:$0xff] }
  0x28   : > { %621 = vmatpush1.msra.mxu0 %v417_v47  ;;  %556 = vmatpush1.msra.mxu1 %v403_v58  ;;  %v505_v24 = vld [vmem:[%s2823_s2 + $0x370] sm:$0xff]  ;;  %v500_v25 = vld [vmem:[%s2823_s2 + $0x348] sm:$0xff]  ;;  %v502_v26 = vld [vmem:[%s2823_s2 + $0x358] sm:$0xff] }
  0x29   : > { %622 = vmatprep.subr.mxu0 %v414_v49  ;;  %557 = vmatprep.subr.mxu1 %v400_v60  ;;  %v499_v27 = vld [vmem:[%s2823_s2 + $0x340] sm:$0xff]  ;;  %v501_v28 = vld [vmem:[%s2823_s2 + $0x350] sm:$0xff]  ;;  %v496_v29 = vld [vmem:[%s2823_s2 + $0x328] sm:$0xff] }
  0x2a   : > { %623 = vmatpush1.msra.mxu0 %v413_v51  ;;  %558 = vmatpush1.msra.mxu1 %v399_v62  ;;  %v498_v30 = vld [vmem:[%s2823_s2 + $0x338] sm:$0xff]  ;;  %v495_v31 = vld [vmem:[%s2823_s2 + $0x320] sm:$0xff]  ;;  %v497_v32 = vld [vmem:[%s2823_s2 + $0x330] sm:$0xff] }
  0x2b   : > { %624 = vmatprep.subr.mxu0 %v410_v53  ;;  %559 = vmatprep.subr.mxu1 %v396_v1  ;;  %v492_v33 = vld [vmem:[%s2823_s2 + $0x308] sm:$0xff]  ;;  %v494_v34 = vld [vmem:[%s2823_s2 + $0x318] sm:$0xff]  ;;  %v491_v35 = vld [vmem:[%s2823_s2 + $0x300] sm:$0xff] }
  0x2c   : > { %625 = vmatpush1.msra.mxu0 %v409_v55  ;;  %560 = vmatpush1.msra.mxu1 %v395_v3  ;;  %v493_v36 = vld [vmem:[%s2823_s2 + $0x310] sm:$0xff]  ;;  %v488_v37 = vld [vmem:[%s2823_s2 + $0x2e8] sm:$0xff]  ;;  %v490_v38 = vld [vmem:[%s2823_s2 + $0x2f8] sm:$0xff] }
  0x2d   : > { %626 = vmatprep.subr.mxu0 %v406_v57  ;;  %561 = vmatprep.subr.mxu1 %v520_v5  ;;  %v487_v39 = vld [vmem:[%s2823_s2 + $0x2e0] sm:$0xff]  ;;  %v489_v40 = vld [vmem:[%s2823_s2 + $0x2f0] sm:$0xff]  ;;  %v484_v41 = vld [vmem:[%s2823_s2 + $0x2c8] sm:$0xff] }
  0x2e   : > { %627 = vmatpush1.msra.mxu0 %v405_v59  ;;  %562 = vmatpush2.msra.mxu1 %v519_v7  ;;  %v486_v42 = vld [vmem:[%s2823_s2 + $0x2d8] sm:$0xff]  ;;  %v483_v43 = vld [vmem:[%s2823_s2 + $0x2c0] sm:$0xff]  ;;  %v485_v44 = vld [vmem:[%s2823_s2 + $0x2d0] sm:$0xff] }
  0x2f   : > { %628 = vmatprep.subr.mxu0 %v402_v61  ;;  %563 = vmatprep.subr.mxu1 %v516_v9  ;;  %v480_v45 = vld [vmem:[%s2823_s2 + $0x2a8] sm:$0xff]  ;;  %v482_v46 = vld [vmem:[%s2823_s2 + $0x2b8] sm:$0xff]  ;;  %v479_v47 = vld [vmem:[%s2823_s2 + $0x2a0] sm:$0xff]  ;;  %v1818_v61 = vmov 1983009808  }
  0x30   : > { %629 = vmatpush1.msra.mxu0 %v401_v63  ;;  %564 = vmatpush2.msra.mxu1 %v515_v11  ;;  %v481_v48 = vld [vmem:[%s2823_s2 + $0x2b0] sm:$0xff]  ;;  %v476_v49 = vld [vmem:[%s2823_s2 + $0x288] sm:$0xff]  ;;  %v478_v50 = vld [vmem:[%s2823_s2 + $0x298] sm:$0xff]  ;;  %v682_v62 = vunpack.c.l.s4 %v1818_v61  ;;  %v684_v63 = vlaneseq }
  0x31   : > { %630 = vmatprep.subr.mxu0 %v398_v2  ;;  %565 = vmatprep.subr.mxu1 %v512_v13  ;;  %v475_v51 = vld [vmem:[%s2823_s2 + $0x280] sm:$0xff]  ;;  %v477_v52 = vld [vmem:[%s2823_s2 + $0x290] sm:$0xff]  ;;  %v472_v53 = vld [vmem:[%s2823_s2 + $0x268] sm:$0xff] }
  0x32   : > { %631 = vmatpush1.msra.mxu0 %v397_v4  ;;  %566 = vmatpush2.msra.mxu1 %v511_v15  ;;  %v474_v54 = vld [vmem:[%s2823_s2 + $0x278] sm:$0xff]  ;;  %v471_v55 = vld [vmem:[%s2823_s2 + $0x260] sm:$0xff]  ;;  %v473_v56 = vld [vmem:[%s2823_s2 + $0x270] sm:$0xff]  ;;  %v683_v1 = vunpack.c.0.s8 %v682_v62  ;;  %v2269_v2 = vshrl.u32 %v684_v63, 7 }
  0x33   : > { %632 = vmatprep.subr.mxu0 %v522_v6  ;;  %567 = vmatprep.subr.mxu1 %v508_v17  ;;  %v468_v57 = vld [vmem:[%s2823_s2 + $0x248] sm:$0xff]  ;;  %v470_v58 = vld [vmem:[%s2823_s2 + $0x258] sm:$0xff]  ;;  %v467_v59 = vld [vmem:[%s2823_s2 + $0x240] sm:$0xff] }
  0x34   : > { %633 = vmatpush2.msra.mxu0 %v521_v8  ;;  %568 = vmatpush2.msra.mxu1 %v507_v19  ;;  %v469_v60 = vld [vmem:[%s2823_s2 + $0x250] sm:$0xff]  ;;  %v325_v3 = vld [vmem:[%s317_s16] sm:$0xff]  ;;  %v686_v5 = vsub.s32 %v683_v1, %v2269_v2  ;;  %v464_v6 = vld [vmem:[%s2823_s2 + $0x228] sm:$0xff]  ;;  %s1836_s16 = smov 3  }
  0x35   : > { %634 = vmatprep.subr.mxu0 %v518_v10  ;;  %569 = vmatprep.subr.mxu1 %v504_v21  ;;  %v680_v4 = vcombine.low %v325_v3, %v325_v3  ;;  %v466_v7 = vld [vmem:[%s2823_s2 + $0x238] sm:$0xff]  ;;  %v463_v8 = vld [vmem:[%s2823_s2 + $0x220] sm:$0xff]  ;;  %v465_v9 = vld [vmem:[%s2823_s2 + $0x230] sm:$0xff] }
  0x36   : > { %635 = vmatpush2.msra.mxu0 %v517_v12  ;;  %570 = vmatpush2.msra.mxu1 %v503_v23  ;;  %v460_v10 = vld [vmem:[%s2823_s2 + $0x208] sm:$0xff]  ;;  %v462_v12 = vld [vmem:[%s2823_s2 + $0x218] sm:$0xff]  ;;  %v459_v13 = vld [vmem:[%s2823_s2 + $0x200] sm:$0xff]  ;;  %v2306_v23 = vrot.slane %v325_v3, %v686_v5 }
  0x37   : > { %636 = vmatprep.subr.mxu0 %v514_v14  ;;  %571 = vmatprep.subr.mxu1 %v500_v25  ;;  %v2287_v11 = vrot.slane %v680_v4, %v686_v5  ;;  %v461_v14 = vld [vmem:[%s2823_s2 + $0x210] sm:$0xff]  ;;  %v523_v25 = vld [vmem:[%s2827_s6] sm:$0xf] }
  0x38   : > { %637 = vmatpush2.msra.mxu0 %v513_v16  ;;  %572 = vmatpush2.msra.mxu1 %v499_v27  ;;  %v1819_v16 = vmov 0   ;;  %v2320_v27 = vcombine.low %v2306_v23, %v2306_v23 }
  0x39   : > { %638 = vmatprep.subr.mxu0 %v510_v18  ;;  %573 = vmatprep.subr.mxu1 %v496_v29  ;;  %v695_v17 = vcombine.high %v2287_v11, %v2287_v11 }
  0x3a   : > { %639 = vmatpush2.msra.mxu0 %v509_v20  ;;  %574 = vmatpush2.msra.mxu1 %v495_v31 }
  0x3b   : > { %640 = vmatprep.subr.mxu0 %v506_v22  ;;  %575 = vmatprep.subr.mxu1 %v492_v33 }
  0x3c   : > { %641 = vmatpush2.msra.mxu0 %v505_v24  ;;  %576 = vmatpush2.msra.mxu1 %v491_v35 }
  0x3d   : > { %642 = vmatprep.subr.mxu0 %v502_v26  ;;  %577 = vmatprep.subr.mxu1 %v488_v37  ;;  %v696_v26 = vcombine.high %v2306_v23, %v2306_v23 }
  0x3e   : > { %643 = vmatpush2.msra.mxu0 %v501_v28  ;;  %578 = vmatpush2.msra.mxu1 %v487_v39  ;;  %v2326_v28 = vcombine.low %v2287_v11, %v2287_v11 }
  0x3f   : > { %644 = vmatprep.subr.mxu0 %v498_v30  ;;  %579 = vmatprep.subr.mxu1 %v484_v41 }
  0x40   : > { %645 = vmatpush2.msra.mxu0 %v497_v32  ;;  %580 = vmatpush2.msra.mxu1 %v483_v43 }
  0x41   : > { %646 = vmatprep.subr.mxu0 %v494_v34  ;;  %581 = vmatprep.subr.mxu1 %v480_v45 }
  0x42   : > { %647 = vmatpush2.msra.mxu0 %v493_v36  ;;  %582 = vmatpush2.msra.mxu1 %v479_v47 }
  0x43   : > { %648 = vmatprep.subr.mxu0 %v490_v38  ;;  %583 = vmatprep.subr.mxu1 %v476_v49 }
  0x44   : > { %649 = vmatpush2.msra.mxu0 %v489_v40  ;;  %584 = vmatpush2.msra.mxu1 %v475_v51 }
  0x45   : > { %650 = vmatprep.subr.mxu0 %v486_v42  ;;  %585 = vmatprep.subr.mxu1 %v472_v53 }
  0x46   : > { %651 = vmatpush2.msra.mxu0 %v485_v44  ;;  %586 = vmatpush2.msra.mxu1 %v471_v55 }
  0x47   : > { %652 = vmatprep.subr.mxu0 %v482_v46  ;;  %587 = vmatprep.subr.mxu1 %v468_v57 }
  0x48   : > { %653 = vmatpush2.msra.mxu0 %v481_v48  ;;  %588 = vmatpush2.msra.mxu1 %v467_v59 }
  0x49   : > { %654 = vmatprep.subr.mxu0 %v478_v50  ;;  %589 = vmatprep.subr.mxu1 %v464_v6 }
  0x4a   : > { %655 = vmatpush2.msra.mxu0 %v477_v52  ;;  %590 = vmatpush2.msra.mxu1 %v463_v8 }
  0x4b   : > { %656 = vmatprep.subr.mxu0 %v474_v54  ;;  %591 = vmatprep.subr.mxu1 %v460_v10 }
  0x4c   : > { %657 = vmatpush2.msra.mxu0 %v473_v56  ;;  %592 = vmatpush2.msra.mxu1 %v459_v13 }
  0x4d   : > { %658 = vmatprep.subr.mxu0 %v470_v58  ;;  %1804 = vset.pattern.permute.xlu0 %v1819_v16 }
  0x4e   : > { %659 = vmatpush2.msra.mxu0 %v469_v60  ;;  %697 = vrot.lane.b32.xlu1 %v2287_v11, %s1820_s13 }
  0x4f   : > { %660 = vmatprep.subr.mxu0 %v466_v7  ;;  %1805 = vset.pattern.permute.xlu1 %v1819_v16 }
  0x50   : > { %661 = vmatpush2.msra.mxu0 %v465_v9  ;;  %v1711_v9 = vld [vmem:[%s2827_s6 + $0x4] sm:$0xf] }
  0x51   : > { %662 = vmatprep.subr.mxu0 %v462_v12 }
  0x52   : > { %663 = vmatpush2.msra.mxu0 %v461_v14  ;;  %699 = vrot.lane.b32.xlu1 %v695_v17, %s1820_s13 }
  0x53   : > { %1743 = vmatprep.subr.bf16.mxu0 %v1816_v0 }
  0x56   : > { %701 = vrot.lane.b32.xlu1 %v2306_v23, %s1820_s13 }
  0x5a   : > { %839 = vrot.lane.b32.xlu1 %v2306_v23, %s1822_s17 }
  0x5e   : > { %835 = vrot.lane.b32.xlu1 %v2287_v11, %s1822_s17 }
  0x62   : > { %864 = vrot.lane.b32.xlu1 %v2320_v27, %s1823_s18 }
  0x66   : > { %841 = vrot.lane.b32.xlu1 %v696_v26, %s1822_s17 }
  0x6a   : > { %791 = vrot.lane.b32.xlu1 %v695_v17, %s1824_s19 }
  0x6e   : > { %789 = vrot.lane.b32.xlu1 %v2287_v11, %s1824_s19 }
  0x72   : > { %814 = vrot.lane.b32.xlu1 %v2320_v27, %s1825_s20 }
  0x76   : > { %810 = vrot.lane.b32.xlu1 %v2326_v28, %s1825_s20 }
  0x7a   : > { %751 = vrot.lane.b32.xlu1 %v2306_v23, %s1826_s21 }
  0x7e   : > { %747 = vrot.lane.b32.xlu1 %v2287_v11, %s1826_s21 }
  0x82   : > { %772 = vrot.lane.b32.xlu1 %v2320_v27, %s1827_s22 }
  0x86   : > { %768 = vrot.lane.b32.xlu1 %v2326_v28, %s1827_s22 }
  0xc0   : > { %v698_v35 = vpop.permute.xlu1 %697 }
  0xc4   : > { %v700_v44 = vpop.permute.xlu1 %699 }
  0xc5   : > { %v706_v46 = vsel %vm705_vm4, %v698_v35, %v700_v44 }
  0xc8   : > { %v702_v47 = vpop.permute.xlu1 %701 }
  0xc9   : > { %v707_v61 = vsel %vm705_vm4, %v700_v44, %v702_v47 }
  0xcc   : > { %v2388_v4 = vpop.permute.xlu1 %839 }
  0xd0   : > { %v836_v6 = vpop.permute.xlu1 %835 }
  0xd3   : > { %v375_v15 = vpop.f32.mrf.mxu0 }
  0xd4   : > { %v383_v20 = vrot.slane %v375_v15, 4  ;;  %v2398_v8 = vpop.permute.xlu1 %864 }
  0xd5   : > { %v1741_v18 = vpop.f32.mrf.mxu0 }
  0xd7   : > { %v378_v19 = vpop.f32.mrf.mxu0 }
  0xd8   : > { %v388_v21 = vrot.slane %v378_v19, 4 }
  0xd9   : > { %v1742_v22 = vpop.f32.mrf.mxu0 }
  0xda   : > { %v1799_v24 = vpack.i.bf16 %v383_v20, %v388_v21 }
  0xdc   : > { %1800 = vrot.lane.b32.xlu0 %v1799_v24, %s1821_s14 }
  0xe0   : > { %526 = vperm.xlu0 %1804, %v523_v25  }
  0xe4   : > { %703 = vrot.lane.b32.xlu0 %v696_v26, %s1820_s13 }
  0xe8   : > { %837 = vrot.lane.b32.xlu0 %v695_v17, %s1822_s17  ;;  %s1837_s17 = smov 2  }
  0xec   : > { %862 = vrot.lane.b32.xlu0 %v2287_v11, %s1823_s18 }
  0xf0   : > { %860 = vrot.lane.b32.xlu0 %v2326_v28, %s1823_s18 }
  0xf4   : > { %793 = vrot.lane.b32.xlu0 %v2306_v23, %s1824_s19 }
  0xf8   : > { %866 = vrot.lane.b32.xlu0 %v2306_v23, %s1823_s18  ;;  %s1838_s18 = smov 124  }
  0xfc   : > { %812 = vrot.lane.b32.xlu0 %v2287_v11, %s1825_s20 }
 0x100   : > { %795 = vrot.lane.b32.xlu0 %v696_v26, %s1824_s19 }
 0x104   : > { %749 = vrot.lane.b32.xlu0 %v695_v17, %s1826_s21 }
 0x108   : > { %816 = vrot.lane.b32.xlu0 %v2306_v23, %s1825_s20 }
 0x10c   : > { %770 = vrot.lane.b32.xlu0 %v2287_v11, %s1827_s22 }
 0x110   : > { %753 = vrot.lane.b32.xlu0 %v696_v26, %s1826_s21 }
 0x14e   : > { %v1801_v29 = vpop.permute.xlu0 %1800 }
 0x14f   : > { %v1803_v30 = vunpack.i.h.bf16 %v1801_v29  ;;  %v1802_v31 = vunpack.i.l.bf16 %v1801_v29 }
 0x151   : > { %v394_v32 = vsel %vm392_vm3, %v378_v19, %v1802_v31  ;;  %v393_v33 = vsel %vm392_vm3, %v375_v15, %v1803_v30  ;;  %vm807_vm3 = vcmask 834560  }
 0x152   : > { %593 = vmatprep.mubr.f32.mxu1 %v394_v32  ;;  %664 = vmatprep.mubr.f32.mxu0 %v394_v32 }
 0x153   : > { %594 = vmatmul.mubr.f32.vlgmr.msra.gmra.mxu1 %v393_v33  ;;  %665 = vmatmul.mubr.f32.vlgmr.msra.gmra.mxu0 %v393_v33 }
 0x154   : > { %1041 = vmatprep.mubr.bf16.mxu1 %v1819_v16  ;;  %1753 = vmatprep.mubr.msk.bf16.mxu0 %vm1817_vm0, %v1816_v0 }
 0x15b   : > { %v527_v34 = vpop.permute.xlu0 %526 }
 0x15f   : > { %v704_v48 = vpop.permute.xlu0 %703 }
 0x160   : > { %v708_v52 = vsel %vm705_vm4, %v702_v47, %v704_v48 }
 0x163   : > { %v838_v5 = vpop.permute.xlu0 %837 }
 0x167   : > { %v2396_v7 = vpop.permute.xlu0 %862 }
 0x16b   : > { %v861_v10 = vpop.permute.xlu0 %860 }
 0x16f   : > { %v2409_v13 = vpop.permute.xlu0 %793 }
 0x173   : > { %v2413_v15 = vpop.permute.xlu0 %866 }
 0x177   : > { %v2417_v18 = vpop.permute.xlu0 %812 }
 0x17b   : > { %v2421_v20 = vpop.permute.xlu0 %795 }
 0x17f   : > { %v2423_v21 = vpop.permute.xlu0 %749 }
 0x213   : > { %v595_v36 = vpop.f32.mrf.mxu1  ;;  %v666_v37 = vpop.f32.mrf.mxu0 }
 0x214   : > { %v596_v38 = vadd.f32 %v595_v36, %v527_v34  ;;  %v667_v39 = vadd.f32 %v666_v37, %v527_v34 }
 0x215   : > { %v597_v45 = vpop.f32.mrf.mxu1  ;;  %v668_v50 = vpop.f32.mrf.mxu0 }
 0x216   : > { %v671_v40 = vmax.f32 %v596_v38, 0.0  ;;  %v673_v41 = vmax.f32 %v667_v39, 0.0  ;;  %v598_v49 = vadd.f32 %v597_v45, %v527_v34  ;;  %v669_v54 = vadd.f32 %v668_v50, %v527_v34 }
 0x218   : > { %v675_v42 = vpack.c.bf16 %v671_v40, %v671_v40  ;;  %v677_v43 = vpack.c.bf16 %v673_v41, %v673_v41  ;;  %v672_v53 = vmax.f32 %v598_v49, 0.0  ;;  %v674_v57 = vmax.f32 %v669_v54, 0.0 }
 0x21a   : > { %823 = vrot.lane.b32.xlu0 %v675_v42, %s1828_s23  ;;  %827 = vrot.lane.b32.xlu1 %v677_v43, %s1828_s23  ;;  %v2353_v51 = vsel %vm872_vm5, %v675_v42, %v706_v46  ;;  %v2360_v55 = vsel %vm872_vm5, %v677_v43, %v708_v52  ;;  %v676_v56 = vpack.c.bf16 %v672_v53, %v672_v53  ;;  %v714_v58 = vrot.slane %v677_v43, 4 }
 0x21b   : > { %v678_v59 = vpack.c.bf16 %v674_v57, %v674_v57  ;;  %v712_v60 = vrot.slane %v675_v42, 4  ;;  %v844_v57 = vsel %vm843_vm7, %v836_v6, %v838_v5 }
 0x21c   : > { %v2373_v62 = vsel %vm872_vm5, %v676_v56, %v707_v61  ;;  %v713_v1 = vrot.slane %v676_v56, 4 }
 0x21d   : > { %v972_v63 = vsel %vm872_vm5, %v678_v59, %v704_v48  ;;  %v847_v3 = vrot.slane %v678_v59, 4 }
 0x21e   : > { %784 = vrot.lane.b32.xlu0 %v677_v43, %s1829_s24  ;;  %742 = vrot.lane.b32.xlu1 %v677_v43, %s1830_s25 }
 0x222   : > { %780 = vrot.lane.b32.xlu0 %v675_v42, %s1829_s24  ;;  %977 = vrot.lane.b32.xlu1 %v2353_v51, %s1820_s13 }
 0x226   : > { %738 = vrot.lane.b32.xlu0 %v675_v42, %s1830_s25  ;;  %981 = vrot.lane.b32.xlu1 %v2360_v55, %s1820_s13 }
 0x22a   : > { %825 = vrot.lane.b32.xlu0 %v676_v56, %s1828_s23  ;;  %852 = vrot.lane.b32.xlu1 %v714_v58, %s1831_s26 }
 0x22e   : > { %829 = vrot.lane.b32.xlu0 %v678_v59, %s1828_s23  ;;  %848 = vrot.lane.b32.xlu1 %v712_v60, %s1831_s26 }
 0x232   : > { %740 = vrot.lane.b32.xlu0 %v676_v56, %s1830_s25  ;;  %782 = vrot.lane.b32.xlu1 %v676_v56, %s1829_s24  ;;  %v845_v56 = vsel %vm843_vm7, %v838_v5, %v2388_v4  ;;  %v869_v5 = vsel %vm868_vm8, %v861_v10, %v2396_v7  ;;  %v871_v10 = vsel %vm868_vm8, %v2398_v8, %v2413_v15 }
 0x236   : > { %979 = vrot.lane.b32.xlu0 %v2373_v62, %s1820_s13  ;;  %805 = vrot.lane.b32.xlu1 %v714_v58, %s1832_s29 }
 0x23a   : > { %983 = vrot.lane.b32.xlu0 %v972_v63, %s1820_s13  ;;  %801 = vrot.lane.b32.xlu1 %v712_v60, %s1832_s29 }
 0x23e   : > { %850 = vrot.lane.b32.xlu0 %v713_v1, %s1831_s26  ;;  %763 = vrot.lane.b32.xlu1 %v714_v58, %s1833_s30 }
 0x242   : > { %774 = vrot.lane.b32.xlu0 %v2306_v23, %s1827_s22  ;;  %759 = vrot.lane.b32.xlu1 %v712_v60, %s1833_s30 }
 0x246   : > { %728 = vrot.lane.b32.xlu0 %v2287_v11, %s1834_s9  ;;  %854 = vrot.lane.b32.xlu1 %v847_v3, %s1831_s26  ;;  %v2405_v11 = vpop.permute.xlu1 %841 }
 0x24a   : > { %803 = vrot.lane.b32.xlu0 %v713_v1, %s1832_s29  ;;  %719 = vrot.lane.b32.xlu1 %v714_v58, %s1835_s10  ;;  %v2407_v12 = vpop.permute.xlu1 %791  ;;  %v870_v58 = vsel %vm868_vm8, %v2396_v7, %v2398_v8  ;;  %v846_v7 = vsel %vm843_vm7, %v2388_v4, %v2405_v11  ;;  %vm765_vm7 = vcmask 850944   ;;  %vm721_vm8 = vcmask 1039360  }
 0x24e   : > { %761 = vrot.lane.b32.xlu0 %v713_v1, %s1833_s30  ;;  %715 = vrot.lane.b32.xlu1 %v712_v60, %s1835_s10  ;;  %v2411_v14 = vpop.permute.xlu1 %789 }
 0x252   : > { %717 = vrot.lane.b32.xlu0 %v713_v1, %s1835_s10  ;;  %730 = vrot.lane.b32.xlu1 %v2320_v27, %s1834_s9  ;;  %v2415_v17 = vpop.permute.xlu1 %814 }
 0x256   : > { %726 = vrot.lane.b32.xlu0 %v2326_v28, %s1834_s9  ;;  %732 = vrot.lane.b32.xlu1 %v2306_v23, %s1834_s9  ;;  %v2419_v19 = vpop.permute.xlu1 %810  ;;  %v2427_v23 = vpop.permute.xlu0 %816 }
 0x257   : > { %v819_v4 = vsel %vm818_vm12, %v2419_v19, %v2417_v18  ;;  %v821_v8 = vsel %vm818_vm12, %v2415_v17, %v2427_v23 }
 0x25a   : > { %993 = vperm.xlu0 %1804, %v1711_v9   ;;  %v2425_v22 = vpop.permute.xlu1 %751  ;;  %v2431_v25 = vpop.permute.xlu0 %770 }
 0x25e   : > { %v2429_v24 = vpop.permute.xlu1 %747  ;;  %v2435_v27 = vpop.permute.xlu0 %753 }
 0x262   : > { %v2433_v26 = vpop.permute.xlu1 %772 }
 0x266   : > { %v2437_v28 = vpop.permute.xlu1 %768 }
 0x28c   : > { %v824_v29 = vpop.permute.xlu0 %823  ;;  %v828_v30 = vpop.permute.xlu1 %827 }
 0x290   : > { %v2439_v31 = vpop.permute.xlu0 %784  ;;  %v2441_v32 = vpop.permute.xlu1 %742 }
 0x294   : > { %v2443_v33 = vpop.permute.xlu0 %780  ;;  %v978_v34 = vpop.permute.xlu1 %977 }
 0x298   : > { %v2445_v35 = vpop.permute.xlu0 %738  ;;  %v982_v36 = vpop.permute.xlu1 %981 }
 0x29c   : > { %v826_v37 = vpop.permute.xlu0 %825  ;;  %v853_v38 = vpop.permute.xlu1 %852 }
 0x29d   : > { %v832_v52 = vsel %vm831_vm6, %v824_v29, %v826_v37  ;;  %v833_v53 = vsel %vm831_vm6, %v826_v37, %v828_v30 }
 0x29e   : > { %v948_v61 = vsel %vm872_vm5, %v832_v52, %v844_v57  ;;  %v951_v63 = vsel %vm872_vm5, %v833_v53, %v845_v56  ;;  %v777_v53 = vsel %vm776_vm14, %v2437_v28, %v2431_v25 }
 0x2a0   : > { %v830_v39 = vpop.permute.xlu0 %829  ;;  %v849_v40 = vpop.permute.xlu1 %848 }
 0x2a4   : > { %v2447_v41 = vpop.permute.xlu0 %740  ;;  %v783_v42 = vpop.permute.xlu1 %782 }
 0x2a8   : > { %v980_v43 = vpop.permute.xlu0 %979  ;;  %v2449_v44 = vpop.permute.xlu1 %805 }
 0x2a9   : > { %v985_v45 = vsel %vm705_vm4, %v978_v34, %v980_v43  ;;  %v986_v46 = vsel %vm705_vm4, %v980_v43, %v982_v36  ;;  %v799_v43 = vsel %vm797_vm11, %v2407_v12, %v2409_v13 }
 0x2aa   : > { %v1001_v47 = vsel %vm337_vm1, %v985_v45, 0  ;;  %1712 = vmatprep.subr.msk.bf16.mxu1 %vm337_vm1, %v986_v46  ;;  %v798_v45 = vsel %vm797_vm11, %v2411_v14, %v2407_v12  ;;  %v800_v46 = vsel %vm797_vm11, %v2409_v13, %v2421_v20  ;;  %v787_v13 = vsel %vm786_vm15, %v2443_v33, %v783_v42 }
 0x2ab   : > { %1016 = vmatpush1.bf16.msra.mxu1 %v1001_v47  ;;  %v788_v14 = vsel %vm786_vm15, %v783_v42, %v2439_v31  ;;  %v930_v19 = vsel %vm872_vm5, %v2439_v31, %v800_v46  ;;  %v758_v33 = vsel %vm755_vm13, %v2425_v22, %v2435_v27  ;;  %v745_v42 = vsel %vm744_vm2, %v2445_v35, %v2447_v41 }
 0x2ac   : > { %v984_v48 = vpop.permute.xlu0 %983  ;;  %v2455_v49 = vpop.permute.xlu1 %801  ;;  %v924_v47 = vsel %vm872_vm5, %v787_v13, %v798_v45  ;;  %v746_v35 = vsel %vm744_vm2, %v2447_v41, %v2441_v32  ;;  %v906_v56 = vsel %vm872_vm5, %v2441_v32, %v758_v33  ;;  %vm734_vm11 = vcmask 629760  }
 0x2ad   : > { %v987_v50 = vsel %vm705_vm4, %v982_v36, %v984_v48  ;;  %v927_v48 = vsel %vm872_vm5, %v788_v14, %v799_v43 }
 0x2ae   : > { %v1007_v54 = vsel %vm337_vm1, %v987_v50, 0 }
 0x2af   : > { %1744 = vmatpush3.bf16.msra.mxu0 %v1007_v54 }
 0x2b0   : > { %v851_v59 = vpop.permute.xlu0 %850  ;;  %v2467_v60 = vpop.permute.xlu1 %763  ;;  %1745 = vmatprep.subr.bf16.mxu0 %v1816_v0 }
 0x2b1   : > { %v857_v1 = vsel %vm856_vm9, %v849_v40, %v851_v59  ;;  %v858_v3 = vsel %vm856_vm9, %v851_v59, %v853_v38  ;;  %v834_v40 = vsel %vm831_vm6, %v828_v30, %v830_v39  ;;  %v820_v30 = vsel %vm818_vm12, %v2417_v18, %v2415_v17 }
 0x2b2   : > { %v956_v6 = vsel %vm337_vm1, %v948_v61, %v857_v1  ;;  %v958_v9 = vsel %vm337_vm1, %v951_v63, %v858_v3  ;;  %v954_v15 = vsel %vm872_vm5, %v834_v40, %v846_v7  ;;  %v757_v18 = vsel %vm755_vm13, %v2423_v21, %v2425_v22 }
 0x2b3   : > { %v965_v29 = vsel %vm888_vm10, %v958_v9, %v870_v58  ;;  %v962_v34 = vsel %vm888_vm10, %v956_v6, %v869_v5  ;;  %v756_v17 = vsel %vm755_vm13, %v2429_v24, %v2423_v21  ;;  %v936_v21 = vsel %vm337_vm1, %v930_v19, %v2449_v44 }
 0x2b4   : > { %v775_v36 = vpop.permute.xlu0 %774  ;;  %1017 = vmatprep.subr.bf16.mxu1 %v965_v29  ;;  %v760_v37 = vpop.permute.xlu1 %759  ;;  %v944_v54 = vsel %vm888_vm10, %v936_v21, %v821_v8  ;;  %v900_v41 = vsel %vm872_vm5, %v745_v42, %v756_v17  ;;  %v912_v32 = vsel %vm337_vm1, %v906_v56, %v2467_v60  ;;  %vm996_vm12 = vcmask 588800  }
 0x2b5   : > { %1018 = vmatpush1.bf16.msra.mxu1 %v962_v34  ;;  %v779_v57 = vsel %vm776_vm14, %v2433_v26, %v775_v36  ;;  %vm1112_vm13 = vcmask 744448  }
 0x2b6   : > { %v920_v3 = vsel %vm888_vm10, %v912_v32, %v779_v57 }
 0x2b8   : > { %v2497_v11 = vpop.permute.xlu0 %728  ;;  %v855_v39 = vpop.permute.xlu1 %854 }
 0x2b9   : > { %v859_v12 = vsel %vm856_vm9, %v853_v38, %v855_v39  ;;  %v778_v38 = vsel %vm776_vm14, %v2431_v25, %v2433_v26  ;;  %v903_v25 = vsel %vm872_vm5, %v746_v35, %v757_v18  ;;  %vm1122_vm14 = vcmask 15360  }
 0x2ba   : > { %v960_v20 = vsel %vm337_vm1, %v954_v15, %v859_v12 }
 0x2bb   : > { %v968_v23 = vsel %vm888_vm10, %v960_v20, %v871_v10 }
 0x2bc   : > { %v804_v24 = vpop.permute.xlu0 %803  ;;  %1746 = vmatpush3.bf16.msra.mxu0 %v968_v23  ;;  %v720_v31 = vpop.permute.xlu1 %719 }
 0x2bd   : > { %v808_v22 = vsel %vm807_vm3, %v2455_v49, %v804_v24  ;;  %v809_v27 = vsel %vm807_vm3, %v804_v24, %v2449_v44  ;;  %1747 = vmatprep.subr.bf16.mxu0 %v1816_v0  ;;  %v887_v10 = vsel %vm337_vm1, %v2360_v55, %v720_v31 }
 0x2be   : > { %v932_v50 = vsel %vm337_vm1, %v924_v47, %v808_v22  ;;  %v934_v52 = vsel %vm337_vm1, %v927_v48, %v809_v27 }
 0x2bf   : > { %v941_v49 = vsel %vm888_vm10, %v934_v52, %v820_v30  ;;  %v938_v44 = vsel %vm888_vm10, %v932_v50, %v819_v4  ;;  %v988_v4 = vld [vmem:[%s2825_s4] sm:$0x3] }
 0x2c0   : > { %v762_v58 = vpop.permute.xlu0 %761  ;;  %1019 = vmatprep.subr.bf16.mxu1 %v941_v49  ;;  %1748 = vmatpush3.bf16.msra.mxu0 %v944_v54  ;;  %v716_v59 = vpop.permute.xlu1 %715  ;;  %v1134_v54 = vsub.s32 0, %v2269_v2 }
 0x2c1   : > { %v766_v28 = vsel %vm765_vm7, %v760_v37, %v762_v58  ;;  %v767_v61 = vsel %vm765_vm7, %v762_v58, %v2467_v60  ;;  %1020 = vmatpush1.bf16.msra.mxu1 %v938_v44  ;;  %1749 = vmatprep.subr.bf16.mxu0 %v1816_v0  ;;  %v1093_v44 = vld [vmem:[%s2828_s7] ss:$2 sm:$0x7] }
 0x2c2   : > { %v908_v26 = vsel %vm337_vm1, %v900_v41, %v766_v28  ;;  %v910_v63 = vsel %vm337_vm1, %v903_v25, %v767_v61  ;;  %v1142_v41 = vsub.s32 2, %v2269_v2  ;;  %v2619_v57 = vrot.slane %v1093_v44, %v1134_v54 }
 0x2c3   : > { %v917_v1 = vsel %vm888_vm10, %v910_v63, %v778_v38  ;;  %v914_v5 = vsel %vm888_vm10, %v908_v26, %v777_v53  ;;  %v1138_v63 = vsub.s32 1, %v2269_v2 }
 0x2c4   : > { %v718_v6 = vpop.permute.xlu0 %717  ;;  %1021 = vmatprep.subr.bf16.mxu1 %v917_v1  ;;  %1750 = vmatpush3.bf16.msra.mxu0 %v920_v3  ;;  %v731_v9 = vpop.permute.xlu1 %730  ;;  %v2622_v28 = vrot.slane %v1093_v44, %v1142_v41  ;;  %v1715_v1 = vld [vmem:[%s2828_s7 + $0x1] ss:$2 sm:$0x7] }
 0x2c5   : > { %v723_v29 = vsel %vm721_vm8, %v718_v6, %v720_v31  ;;  %v736_v60 = vsel %vm734_vm11, %v2497_v11, %v731_v9  ;;  %1022 = vmatpush1.bf16.msra.mxu1 %v914_v5  ;;  %1751 = vmatprep.subr.bf16.mxu0 %v1816_v0  ;;  %v722_v34 = vsel %vm721_vm8, %v716_v59, %v718_v6 }
 0x2c6   : > { %v885_v36 = vsel %vm337_vm1, %v2373_v62, %v723_v29  ;;  %v883_v43 = vsel %vm337_vm1, %v2353_v51, %v722_v34  ;;  %v2632_v6 = vrot.slane %v1715_v1, %v1138_v63  ;;  %v2639_v2 = vrot.slane %v1093_v44, %v1138_v63 }
 0x2c7   : > { %v893_v37 = vsel %vm888_vm10, %v885_v36, %v736_v60 }
 0x2c8   : > { %v727_v40 = vpop.permute.xlu0 %726  ;;  %1023 = vmatprep.subr.bf16.mxu1 %v893_v37  ;;  %v733_v7 = vpop.permute.xlu1 %732 }
 0x2c9   : > { %v735_v45 = vsel %vm734_vm11, %v727_v40, %v2497_v11  ;;  %v737_v46 = vsel %vm734_vm11, %v731_v9, %v733_v7  ;;  %vm1156_vm11 = vcmask 1014784   ;;  %v2634_v9 = vrot.slane %v1715_v1, %v1134_v54 }
 0x2ca   : > { %v890_v30 = vsel %vm888_vm10, %v883_v43, %v735_v45  ;;  %v896_v62 = vsel %vm888_vm10, %v887_v10, %v737_v46  ;;  %v2646_v10 = vrot.slane %v1715_v1, %v1142_v41 }
 0x2cb   : > { %1024 = vmatpush1.bf16.msra.mxu1 %v890_v30  ;;  %1752 = vmatpush3.bf16.msra.mxu0 %v896_v62 }
 0x2cc   : > { %1757 = vmatprep.subr.bf16.mxu0 %v1816_v0 }
 0x2ce   : > { %1713 = vmatmul.mubr.msk.bf16.vlgmr.msra.gmra.mxu1 %vm996_vm12, %v988_v4  ;;  %1754 = vmatmul.mubr.msk.bf16.vlgmr.msra.gmra.mxu0 %vm996_vm12, %v988_v4 }
 0x2cf   : > { %1763 = vmatprep.mubr.msk.bf16.mxu0 %vm1817_vm0, %v1816_v0  ;;  %1443 = vmatprep.mubr.bf16.mxu1 %v1819_v16  ;;  %vm1105_vm0 = vcmask 23552  }
 0x2d5   : > { %v994_v51 = vpop.permute.xlu0 %993 }
 0x38e   : > { %v1043_v55 = vpop.f32.mrf.mxu1  ;;  %v1084_v11 = vpop.f32.mrf.mxu0 }
 0x38f   : > { %v1085_v39 = vadd.f32 %v1084_v11, %v994_v51  ;;  %v1044_v18 = vadd.f32 %v1043_v55, %v994_v51 }
 0x390   : > { %v1045_v8 = vpop.f32.mrf.mxu1  ;;  %v1755_v15 = vpop.f32.mrf.mxu0 }
 0x391   : > { %v1092_v12 = vmax.f32 %v1085_v39, 0.0  ;;  %v1046_v13 = vadd.f32 %v1045_v8, %v994_v51  ;;  %v1090_v16 = vmax.f32 %v1044_v18, 0.0 }
 0x392   : > { %v1047_v14 = vpop.f32.mrf.mxu1  ;;  %v1087_v20 = vpop.f32.mrf.mxu0 }
 0x393   : > { %v1091_v17 = vmax.f32 %v1046_v13, 0.0  ;;  %1103 = vrot.lane.b32.xlu0 %v1092_v12, %s1836_s16 }
 0x394   : > { %v1048_v19 = vpop.f32.mrf.mxu1  ;;  %v1756_v23 = vpop.f32.mrf.mxu0 }
 0x395   : > { %1101 = vrot.lane.b32.xlu1 %v1091_v17, %s1836_s16 }
 0x399   : > { %1099 = vrot.lane.b32.xlu1 %v1090_v16, %s1836_s16 }
 0x405   : > { %v1104_v42 = vpop.permute.xlu0 %1103 }
 0x407   : > { %v1102_v33 = vpop.permute.xlu1 %1101 }
 0x408   : > { %v1107_v31 = vsel %vm1105_vm0, %v1102_v33, %v1104_v42 }
 0x409   : > { %v2598_v47 = vsel %vm1112_vm13, %v1107_v31, 0.0 }
 0x40b   : > { %v1100_v38 = vpop.permute.xlu1 %1099 }
 0x40c   : > { %v2591_v21 = vsel %vm1105_vm0, %v1100_v38, %v1102_v33  ;;  %v1111_v24 = vsel %vm1105_vm0, 0.0, %v1100_v38 }
 0x40d   : > { %1116 = vrot.lane.b32.xlu0 %v1111_v24, %s1837_s17  ;;  %1118 = vrot.lane.b32.xlu1 %v2591_v21, %s1837_s17 }
 0x411   : > { %1120 = vrot.lane.b32.xlu0 %v2598_v47, %s1837_s17 }
 0x415   : > { %1182 = vrot.lane.b32.xlu0 %v1111_v24, %s1830_s25 }
 0x47f   : > { %v1117_v48 = vpop.permute.xlu0 %1116  ;;  %v1119_v22 = vpop.permute.xlu1 %1118 }
 0x480   : > { %v1128_v27 = vsub.f32 %v1111_v24, %v1117_v48  ;;  %v1123_v35 = vsel %vm1122_vm14, %v1117_v48, %v1119_v22 }
 0x481   : > { %v1129_v50 = vsub.f32 %v2591_v21, %v1123_v35 }
 0x482   : > { %1150 = vrot.lane.b32.xlu1 %v1128_v27, %s1838_s18 }
 0x483   : > { %v1121_v52 = vpop.permute.xlu0 %1120  ;;  %1152 = vrot.lane.b32.xlu0 %v1129_v50, %s1838_s18 }
 0x484   : > { %v1124_v53 = vsel %vm1122_vm14, %v1119_v22, %v1121_v52 }
 0x485   : > { %v1130_v49 = vsub.f32 %v2598_v47, %v1124_v53 }
 0x487   : > { %1154 = vrot.lane.b32.xlu1 %v1130_v49, %s1838_s18  ;;  %1186 = vrot.lane.b32.xlu0 %v2598_v47, %s1830_s25  ;;  %v1183_v56 = vpop.permute.xlu0 %1182 }
 0x48b   : > { %1184 = vrot.lane.b32.xlu1 %v2591_v21, %s1830_s25 }
 0x4f4   : > { %v1151_v58 = vpop.permute.xlu1 %1150 }
 0x4f5   : > { %v1153_v59 = vpop.permute.xlu0 %1152 }
 0x4f6   : > { %v1157_v25 = vsel %vm1156_vm11, %v1151_v58, %v1153_v59 }
 0x4f7   : > { %v1162_v61 = vmul.f32 %v1157_v25, %v2619_v57 }
 0x4f9   : > { %1168 = vrot.lane.b32.xlu1 %v1162_v61, %s1837_s17  ;;  %v1155_v32 = vpop.permute.xlu1 %1154  ;;  %v1187_v3 = vpop.permute.xlu0 %1186 }
 0x4fa   : > { %v1164_v26 = vmul.f32 %v1155_v32, %v2622_v28  ;;  %v1158_v7 = vsel %vm1156_vm11, %v1153_v59, %v1155_v32  ;;  %v1196_v43 = vsub.f32 %v2598_v47, %v1187_v3 }
 0x4fb   : > { %v1163_v45 = vmul.f32 %v1158_v7, %v2639_v2 }
 0x4fc   : > { %v1215_v46 = vmul.f32 %v2646_v10, %v1196_v43 }
 0x4fd   : > { %1172 = vrot.lane.b32.xlu1 %v1164_v26, %s1837_s17  ;;  %v1185_v5 = vpop.permute.xlu1 %1184 }
 0x4fe   : > { %v1189_v29 = vsel %vm744_vm2, %v1183_v56, %v1185_v5  ;;  %v1190_v60 = vsel %vm744_vm2, %v1185_v5, %v1187_v3 }
 0x4ff   : > { %v1194_v34 = vsub.f32 %v1111_v24, %v1189_v29  ;;  %v1195_v36 = vsub.f32 %v2591_v21, %v1190_v60 }
 0x501   : > { %v1214_v37 = vmul.f32 %v2632_v6, %v1195_v36  ;;  %v1213_v40 = vmul.f32 %v2634_v9, %v1194_v34 }
 0x503   : > { %1221 = vrot.lane.b32.xlu1 %v1214_v37, %s1837_s17  ;;  %1219 = vrot.lane.b32.xlu0 %v1213_v40, %s1837_s17 }
 0x507   : > { %1170 = vrot.lane.b32.xlu0 %v1163_v45, %s1837_s17 }
 0x50b   : > { %1223 = vrot.lane.b32.xlu0 %v1215_v46, %s1837_s17 }
 0x56b   : > { %v1169_v30 = vpop.permute.xlu1 %1168 }
 0x56c   : > { %v1179_v62 = vadd.f32 %v1169_v30, %v1111_v24 }
 0x56f   : > { %v1173_v4 = vpop.permute.xlu1 %1172 }
 0x575   : > { %v1220_v51 = vpop.permute.xlu0 %1219  ;;  %v1222_v39 = vpop.permute.xlu1 %1221 }
 0x576   : > { %v1230_v55 = vadd.f32 %v1220_v51, %v1179_v62  ;;  %v1225_v14 = vsel %vm1122_vm14, %v1220_v51, %v1222_v39 }
 0x578   : > { %v2653_v11 = vpack.c.bf16 %v1230_v55, %v1230_v55 }
 0x579   : > { %v1171_v8 = vpop.permute.xlu0 %1170 }
 0x57a   : > { %v1174_v15 = vsel %vm1122_vm14, %v1169_v30, %v1171_v8  ;;  %v1175_v12 = vsel %vm1122_vm14, %v1171_v8, %v1173_v4  ;;  %1272 = vrot.lane.b32.xlu0 %v2653_v11, %s1829_s24  ;;  %1304 = vrot.lane.b32.xlu1 %v2653_v11, %s1820_s13  ;;  %v1250_v38 = vrot.slane %v2653_v11, 4  ;;  %v1239_v42 = vrot.slane %v2653_v11, 6 }
 0x57b   : > { %v1180_v13 = vadd.f32 %v1174_v15, %v2591_v21  ;;  %v1181_v20 = vadd.f32 %v1175_v12, %v2598_v47  ;;  %v1261_v21 = vrot.slane %v2653_v11, 2 }
 0x57d   : > { %v1231_v18 = vadd.f32 %v1225_v14, %v1180_v13  ;;  %v1224_v17 = vpop.permute.xlu0 %1223 }
 0x57e   : > { %v1226_v19 = vsel %vm1122_vm14, %v1222_v39, %v1224_v17 }
 0x57f   : > { %v2665_v23 = vpack.c.bf16 %v1231_v18, %v1231_v18  ;;  %v1232_v16 = vadd.f32 %v1226_v19, %v1181_v20 }
 0x581   : > { %v2667_v33 = vpack.c.bf16 %v1232_v16, %v1232_v16  ;;  %1306 = vrot.lane.b32.xlu0 %v2665_v23, %s1820_s13  ;;  %v1240_v24 = vrot.slane %v2665_v23, 6  ;;  %v1251_v31 = vrot.slane %v2665_v23, 4  ;;  %v1262_v27 = vrot.slane %v2665_v23, 2 }
 0x583   : > { %1308 = vrot.lane.b32.xlu1 %v2667_v33, %s1820_s13  ;;  %v1241_v47 = vrot.slane %v2667_v33, 6  ;;  %v1263_v48 = vrot.slane %v2667_v33, 2  ;;  %v1252_v22 = vrot.slane %v2667_v33, 4 }
 0x585   : > { %1274 = vrot.lane.b32.xlu0 %v2665_v23, %s1829_s24 }
 0x587   : > { %1276 = vrot.lane.b32.xlu1 %v2667_v33, %s1829_s24 }
 0x589   : > { %1288 = vrot.lane.b32.xlu0 %v1250_v38, %s1828_s23 }
 0x58b   : > { %1280 = vrot.lane.b32.xlu1 %v1239_v42, %s1832_s29 }
 0x58d   : > { %1242 = vrot.lane.b32.xlu0 %v1239_v42, %s1835_s10 }
 0x58f   : > { %1296 = vrot.lane.b32.xlu1 %v1261_v21, %s1831_s26 }
 0x591   : > { %1282 = vrot.lane.b32.xlu0 %v1240_v24, %s1832_s29 }
 0x593   : > { %1253 = vrot.lane.b32.xlu1 %v1250_v38, %s1830_s25 }
 0x595   : > { %1290 = vrot.lane.b32.xlu0 %v1251_v31, %s1828_s23 }
 0x597   : > { %1284 = vrot.lane.b32.xlu1 %v1241_v47, %s1832_s29 }
 0x599   : > { %1300 = vrot.lane.b32.xlu0 %v1263_v48, %s1831_s26 }
 0x59b   : > { %1292 = vrot.lane.b32.xlu1 %v1252_v22, %s1828_s23 }
 0x59d   : > { %1244 = vrot.lane.b32.xlu0 %v1240_v24, %s1835_s10 }
 0x59f   : > { %1298 = vrot.lane.b32.xlu1 %v1262_v27, %s1831_s26 }
 0x5a1   : > { %1257 = vrot.lane.b32.xlu0 %v1252_v22, %s1830_s25 }
 0x5a3   : > { %1246 = vrot.lane.b32.xlu1 %v1241_v47, %s1835_s10 }
 0x5a5   : > { %1266 = vrot.lane.b32.xlu0 %v1262_v27, %s1833_s30 }
 0x5a7   : > { %1255 = vrot.lane.b32.xlu1 %v1251_v31, %s1830_s25 }
 0x5a9   : > { %1264 = vrot.lane.b32.xlu0 %v1261_v21, %s1833_s30 }
 0x5ab   : > { %1268 = vrot.lane.b32.xlu1 %v1263_v48, %s1833_s30 }
 0x5ec   : > { %v1273_v35 = vpop.permute.xlu0 %1272  ;;  %v1305_v50 = vpop.permute.xlu1 %1304 }
 0x5f3   : > { %v1307_v52 = vpop.permute.xlu0 %1306 }
 0x5f4   : > { %v1310_v44 = vsel %vm705_vm4, %v1305_v50, %v1307_v52  ;;  %v1716_v50 = vld [vmem:[%s2827_s6 + $0x8] sm:$0xf] }
 0x5f5   : > { %v1309_v53 = vpop.permute.xlu1 %1308 }
 0x5f6   : > { %v1311_v49 = vsel %vm705_vm4, %v1307_v52, %v1309_v53  ;;  %1384 = vrot.lane.b32.xlu1 %v1309_v53, %s1830_s25  ;;  %vm1398_vm4 = vcmask 293888  }
 0x5f7   : > { %v1275_v54 = vpop.permute.xlu0 %1274  ;;  %1382 = vrot.lane.b32.xlu0 %v1311_v49, %s1830_s25 }
 0x5f8   : > { %v1278_v55 = vsel %vm786_vm15, %v1273_v35, %v1275_v54 }
 0x5f9   : > { %v1277_v56 = vpop.permute.xlu1 %1276 }
 0x5fa   : > { %1380 = vrot.lane.b32.xlu1 %v1310_v44, %s1830_s25  ;;  %v1279_v40 = vsel %vm786_vm15, %v1275_v54, %v1277_v56 }
 0x5fb   : > { %v1289_v41 = vpop.permute.xlu0 %1288 }
 0x5fd   : > { %v1281_v58 = vpop.permute.xlu1 %1280 }
 0x5ff   : > { %v1243_v59 = vpop.permute.xlu0 %1242 }
 0x601   : > { %v1297_v25 = vpop.permute.xlu1 %1296 }
 0x603   : > { %v1283_v61 = vpop.permute.xlu0 %1282 }
 0x604   : > { %v1286_v45 = vsel %vm807_vm3, %v1281_v58, %v1283_v61 }
 0x605   : > { %v1254_v32 = vpop.permute.xlu1 %1253  ;;  %v1335_v8 = vsel %vm872_vm5, %v1278_v55, %v1286_v45 }
 0x607   : > { %v1291_v26 = vpop.permute.xlu0 %1290 }
 0x608   : > { %v1294_v62 = vsel %vm831_vm6, %v1289_v41, %v1291_v26 }
 0x609   : > { %v1285_v63 = vpop.permute.xlu1 %1284  ;;  %v1343_v12 = vsel %vm337_vm1, %v1335_v8, %v1294_v62 }
 0x60a   : > { %v1341_v3 = vsel %vm872_vm5, %v1277_v56, %v1285_v63  ;;  %v1287_v29 = vsel %vm807_vm3, %v1283_v61, %v1285_v63 }
 0x60b   : > { %v1301_v1 = vpop.permute.xlu0 %1300  ;;  %v1338_v7 = vsel %vm872_vm5, %v1279_v40, %v1287_v29 }
 0x60d   : > { %v1293_v5 = vpop.permute.xlu1 %1292 }
 0x60e   : > { %v1347_v60 = vsel %vm337_vm1, %v1341_v3, %v1293_v5  ;;  %v1295_v34 = vsel %vm831_vm6, %v1291_v26, %v1293_v5  ;;  %vm1631_vm6 = vcmask 257024  }
 0x60f   : > { %v1245_v36 = vpop.permute.xlu0 %1244  ;;  %v1353_v37 = vsel %vm888_vm10, %v1347_v60, %v1301_v1  ;;  %v1345_v46 = vsel %vm337_vm1, %v1338_v7, %v1295_v34 }
 0x610   : > { %1378 = vrot.lane.b32.xlu1 %v1353_v37, %s1830_s25  ;;  %v1248_v16 = vsel %vm721_vm8, %v1243_v59, %v1245_v36 }
 0x611   : > { %v1299_v43 = vpop.permute.xlu1 %1298 }
 0x612   : > { %v1303_v30 = vsel %vm856_vm9, %v1299_v43, %v1301_v1  ;;  %v1302_v39 = vsel %vm856_vm9, %v1297_v25, %v1299_v43  ;;  %v1354_v1 = vld [vmem:[%s2826_s5] sm:$0x3] }
 0x613   : > { %v1258_v4 = vpop.permute.xlu0 %1257  ;;  %v1351_v51 = vsel %vm888_vm10, %v1345_v46, %v1303_v30  ;;  %v1349_v14 = vsel %vm888_vm10, %v1343_v12, %v1302_v39 }
 0x614   : > { %1376 = vrot.lane.b32.xlu0 %v1351_v51, %s1830_s25 }
 0x615   : > { %v1247_v15 = vpop.permute.xlu1 %1246 }
 0x616   : > { %v1249_v18 = vsel %vm721_vm8, %v1245_v36, %v1247_v15  ;;  %v1320_v17 = vsel %vm872_vm5, %v2667_v33, %v1247_v15  ;;  %v1314_v33 = vsel %vm872_vm5, %v2653_v11, %v1248_v16 }
 0x617   : > { %v1267_v13 = vpop.permute.xlu0 %1266  ;;  %v1317_v38 = vsel %vm872_vm5, %v2665_v23, %v1249_v18  ;;  %v1326_v24 = vsel %vm337_vm1, %v1320_v17, %v1258_v4 }
 0x618   : > { %1374 = vrot.lane.b32.xlu0 %v1349_v14, %s1830_s25 }
 0x619   : > { %v1256_v20 = vpop.permute.xlu1 %1255 }
 0x61a   : > { %v1260_v19 = vsel %vm744_vm2, %v1256_v20, %v1258_v4  ;;  %v1259_v42 = vsel %vm744_vm2, %v1254_v32, %v1256_v20 }
 0x61b   : > { %v1265_v21 = vpop.permute.xlu0 %1264  ;;  %v1324_v47 = vsel %vm337_vm1, %v1317_v38, %v1260_v19  ;;  %v1322_v23 = vsel %vm337_vm1, %v1314_v33, %v1259_v42 }
 0x61c   : > { %v1270_v35 = vsel %vm765_vm7, %v1265_v21, %v1267_v13 }
 0x61d   : > { %v1269_v31 = vpop.permute.xlu1 %1268  ;;  %v1328_v52 = vsel %vm888_vm10, %v1322_v23, %v1270_v35 }
 0x61e   : > { %v1271_v48 = vsel %vm765_vm7, %v1267_v13, %v1269_v31  ;;  %v1332_v22 = vsel %vm888_vm10, %v1326_v24, %v1269_v31  ;;  %v1720_v31 = vld [vmem:[%s2827_s6 + $0xc] sm:$0xf] }
 0x61f   : > { %1372 = vrot.lane.b32.xlu0 %v1332_v22, %s1830_s25  ;;  %v1330_v27 = vsel %vm888_vm10, %v1324_v47, %v1271_v48 }
 0x620   : > { %1370 = vrot.lane.b32.xlu1 %v1330_v27, %s1830_s25 }
 0x623   : > { %1359 = vperm.xlu0 %1804, %v1716_v50  }
 0x624   : > { %1368 = vrot.lane.b32.xlu1 %v1328_v52, %s1830_s25 }
 0x668   : > { %v1385_v11 = vpop.permute.xlu1 %1384 }
 0x669   : > { %v1409_v53 = vsel %vm872_vm5, %v1385_v11, 0  ;;  %v1383_v49 = vpop.permute.xlu0 %1382 }
 0x66a   : > { %v1391_v54 = vsel %vm744_vm2, %v1383_v49, %v1385_v11  ;;  %1758 = vmatpush3.bf16.msra.mxu0 %v1409_v53 }
 0x66b   : > { %1717 = vmatprep.subr.msk.bf16.mxu1 %vm872_vm5, %v1391_v54  ;;  %1759 = vmatprep.subr.bf16.mxu0 %v1816_v0 }
 0x66c   : > { %v1381_v44 = vpop.permute.xlu1 %1380 }
 0x66d   : > { %v1390_v56 = vsel %vm744_vm2, %v1381_v44, %v1383_v49 }
 0x66e   : > { %v1403_v41 = vsel %vm872_vm5, %v1390_v56, 0  ;;  %vm1510_vm5 = vcmask 285696  }
 0x66f   : > { %1422 = vmatpush1.bf16.msra.mxu1 %v1403_v41 }
 0x682   : > { %v1379_v58 = vpop.permute.xlu1 %1378 }
 0x683   : > { %1760 = vmatpush3.bf16.msra.mxu0 %v1379_v58 }
 0x684   : > { %1761 = vmatprep.subr.bf16.mxu0 %v1816_v0 }
 0x686   : > { %v1377_v59 = vpop.permute.xlu0 %1376 }
 0x687   : > { %v1389_v25 = vsel %vm744_vm2, %v1377_v59, %v1379_v58 }
 0x688   : > { %1423 = vmatprep.subr.bf16.mxu1 %v1389_v25 }
 0x68a   : > { %v1375_v61 = vpop.permute.xlu0 %1374 }
 0x68b   : > { %v1388_v32 = vsel %vm744_vm2, %v1375_v61, %v1377_v59 }
 0x68c   : > { %1424 = vmatpush1.bf16.msra.mxu1 %v1388_v32 }
 0x691   : > { %v1373_v26 = vpop.permute.xlu0 %1372 }
 0x692   : > { %1762 = vmatpush3.bf16.msra.mxu0 %v1373_v26  ;;  %v1371_v63 = vpop.permute.xlu1 %1370 }
 0x693   : > { %v1387_v3 = vsel %vm744_vm2, %v1371_v63, %v1373_v26 }
 0x694   : > { %1425 = vmatprep.subr.bf16.mxu1 %v1387_v3 }
 0x695   : > { %1764 = vmatmul.mubr.msk.bf16.vlgmr.msra.gmra.mxu0 %vm1398_vm4, %v1354_v1 }
 0x696   : > { %v1369_v0 = vpop.permute.xlu1 %1368 }
 0x697   : > { %v1386_v5 = vsel %vm744_vm2, %v1369_v0, %v1371_v63 }
 0x698   : > { %1426 = vmatpush1.bf16.msra.mxu1 %v1386_v5 }
 0x69b   : > { %1718 = vmatmul.mubr.msk.bf16.vlgmr.msra.gmra.mxu1 %vm1398_vm4, %v1354_v1 }
 0x69e   : > { %v1360_v29 = vpop.permute.xlu0 %1359 }
 0x755   : > { %v1486_v60 = vpop.f32.mrf.mxu0 }
 0x756   : > { %v1487_v34 = vadd.f32 %v1486_v60, %v1360_v29 }
 0x757   : > { %v1765_v36 = vpop.f32.mrf.mxu0 }
 0x758   : > { %v1494_v37 = vmax.f32 %v1487_v34, 0.0 }
 0x759   : > { %v1489_v40 = vpop.f32.mrf.mxu0 }
 0x75a   : > { %1502 = vrot.lane.b32.xlu0 %v1494_v37, %s1836_s16 }
 0x75b   : > { %v1445_v7 = vpop.f32.mrf.mxu1  ;;  %v1766_v43 = vpop.f32.mrf.mxu0 }
 0x75c   : > { %v1446_v62 = vadd.f32 %v1445_v7, %v1360_v29 }
 0x75d   : > { %v1447_v45 = vpop.f32.mrf.mxu1 }
 0x75e   : > { %v1448_v46 = vadd.f32 %v1447_v45, %v1360_v29  ;;  %v1492_v55 = vmax.f32 %v1446_v62, 0.0 }
 0x75f   : > { %v1449_v30 = vpop.f32.mrf.mxu1 }
 0x760   : > { %v1493_v4 = vmax.f32 %v1448_v46, 0.0 }
 0x761   : > { %v1450_v51 = vpop.f32.mrf.mxu1 }
 0x762   : > { %1500 = vrot.lane.b32.xlu1 %v1493_v4, %s1836_s16 }
 0x766   : > { %1498 = vrot.lane.b32.xlu1 %v1492_v55, %s1836_s16 }
 0x7cc   : > { %v1503_v15 = vpop.permute.xlu0 %1502 }
 0x7d4   : > { %v1501_v39 = vpop.permute.xlu1 %1500 }
 0x7d5   : > { %v1505_v14 = vsel %vm1105_vm0, %v1501_v39, %v1503_v15 }
 0x7d6   : > { %v1511_v20 = vsel %vm1510_vm5, %v1505_v14, 0.0 }
 0x7d8   : > { %v1499_v8 = vpop.permute.xlu1 %1498 }
 0x7d9   : > { %v1504_v12 = vsel %vm1105_vm0, %v1499_v8, %v1501_v39  ;;  %v1509_v13 = vsel %vm1105_vm0, 0.0, %v1499_v8 }
 0x7da   : > { %1514 = vrot.lane.b32.xlu0 %v1509_v13, %s1837_s17  ;;  %1516 = vrot.lane.b32.xlu1 %v1504_v12, %s1837_s17 }
 0x7de   : > { %1518 = vrot.lane.b32.xlu0 %v1511_v20, %s1837_s17 }
 0x7e2   : > { %1562 = vrot.lane.b32.xlu0 %v1509_v13, %s1830_s25 }
 0x84c   : > { %v1515_v18 = vpop.permute.xlu0 %1514  ;;  %v1517_v17 = vpop.permute.xlu1 %1516 }
 0x84d   : > { %v1525_v19 = vsub.f32 %v1509_v13, %v1515_v18  ;;  %v1520_v16 = vsel %vm1122_vm14, %v1515_v18, %v1517_v17 }
 0x84e   : > { %v1526_v38 = vsub.f32 %v1504_v12, %v1520_v16 }
 0x84f   : > { %1531 = vrot.lane.b32.xlu1 %v1525_v19, %s1838_s18 }
 0x850   : > { %v1519_v42 = vpop.permute.xlu0 %1518  ;;  %1533 = vrot.lane.b32.xlu0 %v1526_v38, %s1838_s18 }
 0x851   : > { %v1521_v21 = vsel %vm1122_vm14, %v1517_v17, %v1519_v42 }
 0x852   : > { %v1527_v24 = vsub.f32 %v1511_v20, %v1521_v21 }
 0x854   : > { %1535 = vrot.lane.b32.xlu1 %v1527_v24, %s1838_s18  ;;  %1566 = vrot.lane.b32.xlu0 %v1511_v20, %s1830_s25  ;;  %v1563_v47 = vpop.permute.xlu0 %1562 }
 0x858   : > { %1564 = vrot.lane.b32.xlu1 %v1504_v12, %s1830_s25 }
 0x85c   : > { %1600 = vperm.xlu1 %1805, %v1720_v31  }
 0x8c1   : > { %v1532_v48 = vpop.permute.xlu1 %1531 }
 0x8c2   : > { %v1534_v22 = vpop.permute.xlu0 %1533 }
 0x8c3   : > { %v1537_v54 = vsel %vm1156_vm11, %v1532_v48, %v1534_v22 }
 0x8c4   : > { %v1542_v44 = vmul.f32 %v1537_v54, %v2619_v57 }
 0x8c6   : > { %v1536_v33 = vpop.permute.xlu1 %1535  ;;  %v1567_v27 = vpop.permute.xlu0 %1566 }
 0x8c7   : > { %v1544_v56 = vmul.f32 %v1536_v33, %v2622_v28  ;;  %v1538_v41 = vsel %vm1156_vm11, %v1534_v22, %v1536_v33 }
 0x8c8   : > { %v1543_v58 = vmul.f32 %v1538_v41, %v2639_v2 }
 0x8ca   : > { %v1565_v23 = vpop.permute.xlu1 %1564 }
 0x8cb   : > { %v1568_v35 = vsel %vm744_vm2, %v1563_v47, %v1565_v23  ;;  %v1569_v50 = vsel %vm744_vm2, %v1565_v23, %v1567_v27 }
 0x8cc   : > { %v1573_v52 = vsub.f32 %v1509_v13, %v1568_v35  ;;  %v1574_v11 = vsub.f32 %v1504_v12, %v1569_v50 }
 0x8ce   : > { %v1576_v53 = vmul.f32 %v1573_v52, %v2634_v9  ;;  %v1577_v49 = vmul.f32 %v1574_v11, %v2632_v6  ;;  %v1721_v6 = vld [vmem:[%s2827_s6 + $0x10] sm:$0xf]  ;;  %v1575_v9 = vsub.f32 %v1511_v20, %v1567_v27 }
 0x8d0   : > { %1584 = vrot.lane.b32.xlu0 %v1577_v49, %s1837_s17  ;;  %1582 = vrot.lane.b32.xlu1 %v1576_v53, %s1837_s17  ;;  %v1578_v57 = vmul.f32 %v1575_v9, %v2646_v10 }
 0x8d4   : > { %1552 = vrot.lane.b32.xlu0 %v1544_v56, %s1837_s17  ;;  %1548 = vrot.lane.b32.xlu1 %v1542_v44, %s1837_s17 }
 0x8d7   : > { %v1601_v28 = vpop.permute.xlu1 %1600 }
 0x8d8   : > { %1550 = vrot.lane.b32.xlu0 %v1543_v58, %s1837_s17  ;;  %1610 = vperm.xlu1 %1805, %v1721_v6  }
 0x8dc   : > { %1586 = vrot.lane.b32.xlu0 %v1578_v57, %s1837_s17 }
 0x942   : > { %v1585_v59 = vpop.permute.xlu0 %1584  ;;  %v1583_v25 = vpop.permute.xlu1 %1582 }
 0x943   : > { %v1588_v2 = vsel %vm1122_vm14, %v1583_v25, %v1585_v59 }
 0x946   : > { %v1553_v61 = vpop.permute.xlu0 %1552  ;;  %v1549_v32 = vpop.permute.xlu1 %1548 }
 0x947   : > { %v1559_v26 = vadd.f32 %v1549_v32, %v1509_v13 }
 0x949   : > { %v1593_v5 = vadd.f32 %v1583_v25, %v1559_v26 }
 0x94a   : > { %v1551_v63 = vpop.permute.xlu0 %1550 }
 0x94b   : > { %v1554_v1 = vsel %vm1122_vm14, %v1549_v32, %v1551_v63  ;;  %v1555_v3 = vsel %vm1122_vm14, %v1551_v63, %v1553_v61  ;;  %v1603_v40 = vmul.f32 %v1601_v28, %v1593_v5 }
 0x94c   : > { %v1560_v0 = vadd.f32 %v1554_v1, %v1504_v12  ;;  %v1561_v29 = vadd.f32 %v1555_v3, %v1511_v20 }
 0x94e   : > { %v1594_v10 = vadd.f32 %v1588_v2, %v1560_v0  ;;  %v1587_v60 = vpop.permute.xlu0 %1586 }
 0x94f   : > { %v1589_v34 = vsel %vm1122_vm14, %v1585_v59, %v1587_v60 }
 0x950   : > { %v1595_v36 = vadd.f32 %v1589_v34, %v1561_v29  ;;  %v1604_v7 = vmul.f32 %v1601_v28, %v1594_v10 }
 0x952   : > { %v1605_v37 = vmul.f32 %v1601_v28, %v1595_v36 }
 0x953   : > { %v1611_v43 = vpop.permute.xlu1 %1610 }
 0x954   : > { %v1613_v45 = vadd.f32 %v1611_v43, %v1603_v40  ;;  %v1614_v46 = vadd.f32 %v1611_v43, %v1604_v7  ;;  %v1615_v30 = vadd.f32 %v1611_v43, %v1605_v37 }
 0x956   : > { %v1619_v62 = vcombine.low %v1613_v45, %v1614_v46  ;;  %1622 = vrot.lane.b32.xlu0 %v1615_v30, %s1830_s25 }
 0x958   : > { %1620 = vrot.lane.b32.xlu1 %v1619_v62, %s1830_s25 }
 0x9c8   : > { %v1623_v4 = vpop.permute.xlu0 %1622 }
 0x9c9   : > { %1632 = vst.msk [vmem:[%s322_s15 + $0x8] sm:$0xf] %vm1631_vm6, %v1623_v4  ;;  %v1625_v55 = vrot.slane %v1623_v4, 4 }
 0x9ca   : > { %v1621_v51 = vpop.permute.xlu1 %1620 }
 0x9cb   : > { %v1624_v39 = vrot.slane %v1621_v51, 4 }
 0x9cd   : > { %v1626_v8 = vsel %vm337_vm1, %v1624_v39, %v1625_v55 }
 0x9ce   : > { %v1627_v15 = vsel %vm744_vm2, %v1621_v51, %v1626_v8 }
 0x9cf   : > { %1630 = vst [vmem:[%s322_s15] sm:$0xff] %v1627_v15 }
 0x9d0 PF: > { %s18_s27 = sadd.s32 1, %s1814_s27  }
 0x9d1   : > { %p15_p4 = scmp.ge.s32.totalorder %s18_s27, 4  }
 0x9d3   :  { %17 = sbr.rel (!%p15_p4) target bundleno = 1 (0x1), region = 90 }

</bundles_post_ra>
